<compile_context>
chip_gen: v5e
topology: v5e:2x2
jax: 0.10.0
libtpu: 0.0.40
codegen_flags: <defaults>
</compile_context>

<pallas_src>
import functools

import jax
import jax.numpy as jnp
from jax.experimental import pallas as pl
from jax.experimental.pallas import tpu as pltpu

EPS = 1e-5
LANE = 128


def _round_up(x, m):
    return (x + m - 1) // m * m


def _conv_stats_kernel(p_ref, w_ref, y_ref, sum_ref, sq_ref):
    """bf16 matmul (f32 accumulate) + per-core per-channel sum / sum-of-squares."""
    i = pl.program_id(1)  # inner "arbitrary" axis -> sequential per core
    y = jnp.dot(p_ref[...], w_ref[...], preferred_element_type=jnp.float32)
    y_ref[...] = y

    @pl.when(i == 0)
    def _():
        sum_ref[...] = jnp.zeros_like(sum_ref)
        sq_ref[...] = jnp.zeros_like(sq_ref)

    sum_ref[...] += jnp.sum(y, axis=0).reshape(1, 1, -1)
    sq_ref[...] += jnp.sum(y * y, axis=0).reshape(1, 1, -1)


def _bn_relu_kernel(y_ref, scale_ref, shift_ref, o_ref):
    """Fused per-channel affine (folded BatchNorm) + ReLU, lane-dense tiles."""
    o_ref[...] = jnp.maximum(y_ref[...] * scale_ref[...] + shift_ref[...], 0.0)


def _im2col(x, kh, kw, stride, padding):
    """NCHW -> (N*OH*OW, Cin*kh*kw); K ordering matches Conv2d weight (Cout,Cin,kh,kw)."""
    N, C, H, W = x.shape
    xp = jnp.pad(x, ((0, 0), (0, 0), (padding, padding), (padding, padding)))
    OH = (H + 2 * padding - kh) // stride + 1
    OW = (W + 2 * padding - kw) // stride + 1
    cols = []
    for i in range(kh):
        for j in range(kw):
            cols.append(xp[:, :, i:i + stride * OH:stride, j:j + stride * OW:stride])
    cols = jnp.stack(cols, axis=0).reshape(kh, kw, N, C, OH, OW)
    cols = cols.transpose(2, 4, 5, 3, 0, 1).reshape(N * OH * OW, C * kh * kw)
    return cols, OH, OW


def _choose_tiling(M, K_pad, cout_pad):
    """Pick (TM, NC, M_pad): large row tiles within a conservative VMEM budget."""
    TM, NC = 512, 2

    def est_vmem(tm):  # 2x-buffered bf16 patch tile + 2x f32 y tile + bf16 weight
        return 2 * tm * K_pad * 2 + 2 * tm * cout_pad * 4 + 2 * K_pad * cout_pad * 2

    while TM > 128 and est_vmem(TM) > 20 * 1024 * 1024:
        TM //= 2
    if M <= TM:
        NC, TM = 1, max(8, _round_up(M, 8))
    elif M <= NC * TM:
        NC = 1
    M_pad = _round_up(M, NC * TM)
    return TM, NC, M_pad


def backbone_block_forward(x, conv_w, conv_b, gamma, beta, stride, padding):
    # conv bias cancels exactly under batch-statistics BatchNorm (mean shift).
    del conv_b
    N, Cin, H, W = x.shape
    Cout, _, kh, kw = conv_w.shape

    patches, OH, OW = _im2col(x.astype(jnp.bfloat16), kh, kw, stride, padding)
    M, K = patches.shape
    K_pad = _round_up(K, LANE)
    Cout_pad = _round_up(Cout, LANE)
    TM, NC, M_pad = _choose_tiling(M, K_pad, Cout_pad)
    inner = M_pad // (NC * TM)

    patches = jnp.pad(patches, ((0, M_pad - M), (0, K_pad - K)))
    w_mat = jnp.pad(conv_w.reshape(Cout, K).T.astype(jnp.bfloat16),
                    ((0, K_pad - K), (0, Cout_pad - Cout)))

    row_map = lambda c, i, n=inner: (c * n + i, 0)

    y, ch_sum, ch_sq = pl.pallas_call(
        _conv_stats_kernel,
        out_shape=(
            jax.ShapeDtypeStruct((M_pad, Cout_pad), jnp.float32),
            jax.ShapeDtypeStruct((NC, 1, Cout_pad), jnp.float32),
            jax.ShapeDtypeStruct((NC, 1, Cout_pad), jnp.float32),
        ),
        grid_spec=pltpu.PrefetchScalarGridSpec(
            num_scalar_prefetch=0,
            grid=(NC, inner),
            in_specs=[
                pl.BlockSpec((TM, K_pad), row_map),
                pl.BlockSpec((K_pad, Cout_pad), lambda c, i: (0, 0)),
            ],
            out_specs=[
                pl.BlockSpec((TM, Cout_pad), row_map),
                pl.BlockSpec((1, 1, Cout_pad), lambda c, i: (c, 0, 0)),  # per-core acc
                pl.BlockSpec((1, 1, Cout_pad), lambda c, i: (c, 0, 0)),  # per-core acc
            ],
        ),
        compiler_params=pltpu.CompilerParams(
            dimension_semantics=("parallel", "arbitrary"),
            vmem_limit_bytes=32 * 1024 * 1024,
        ),
    )(patches, w_mat)

    # BatchNorm2d batch statistics (biased variance) folded into scale/shift.
    # Padded rows/channels contribute exactly 0, so divide by the true M.
    mean = jnp.sum(ch_sum, axis=0) / M                               # (1, Cout_pad)
    var = jnp.maximum(jnp.sum(ch_sq, axis=0) / M - mean * mean, 0.0)
    gamma_p = jnp.pad(gamma.astype(jnp.float32), (0, Cout_pad - Cout)).reshape(1, Cout_pad)
    beta_p = jnp.pad(beta.astype(jnp.float32), (0, Cout_pad - Cout)).reshape(1, Cout_pad)
    scale = gamma_p / jnp.sqrt(var + EPS)
    shift = beta_p - mean * scale

    out_flat = pl.pallas_call(
        _bn_relu_kernel,
        out_shape=jax.ShapeDtypeStruct((M_pad, Cout_pad), jnp.float32),
        grid_spec=pltpu.PrefetchScalarGridSpec(
            num_scalar_prefetch=0,
            grid=(M_pad // TM,),
            in_specs=[
                pl.BlockSpec((TM, Cout_pad), lambda i: (i, 0)),
                pl.BlockSpec((1, Cout_pad), lambda i: (0, 0)),
                pl.BlockSpec((1, Cout_pad), lambda i: (0, 0)),
            ],
            out_specs=pl.BlockSpec((TM, Cout_pad), lambda i: (i, 0)),
        ),
        compiler_params=pltpu.CompilerParams(
            dimension_semantics=("parallel",),
            vmem_limit_bytes=32 * 1024 * 1024,
        ),
        input_output_aliases={0: 0},  # BN/ReLU overwrites y's buffer in place
    )(y, scale, shift)

    # (M_pad, Cout_pad) -> NCHW to match the PyTorch module's output layout.
    return out_flat[:M, :Cout].reshape(N, OH, OW, Cout).transpose(0, 3, 1, 2)


def _reference(x, conv_w, conv_b, gamma, beta, stride, padding, conv_dtype=jnp.float32):
    dn = jax.lax.conv_dimension_numbers(x.shape, conv_w.shape, ("NCHW", "OIHW", "NCHW"))
    y = jax.lax.conv_general_dilated(
        x.astype(conv_dtype), conv_w.astype(conv_dtype), (stride, stride),
        [(padding, padding), (padding, padding)], dimension_numbers=dn,
        preferred_element_type=jnp.float32)
    y = y + conv_b[None, :, None, None]
    mean = y.mean(axis=(0, 2, 3), keepdims=True)
    var = ((y - mean) ** 2).mean(axis=(0, 2, 3), keepdims=True)  # biased, like BN
    y = (y - mean) / jnp.sqrt(var + EPS)
    y = y * gamma[None, :, None, None] + beta[None, :, None, None]
    return jnp.maximum(y, 0.0)


if __name__ == "__main__":
    key = jax.random.PRNGKey(0)
    k1, k2, k3, k4, k5 = jax.random.split(key, 5)

    # Backbone_Block(in_c=4, out_c=8, k_size=3, stride=1, padding=1)
    N, Cin, H, W = 2, 4, 32, 32
    Cout, ksize, stride, padding = 8, 3, 1, 1

    x = jax.random.normal(k1, (N, Cin, H, W), jnp.float32)
    fan_in = Cin * ksize * ksize
    bound = 1.0 / (fan_in ** 0.5)
    conv_w = jax.random.uniform(k2, (Cout, Cin, ksize, ksize), jnp.float32, -bound, bound)
    conv_b = jax.random.uniform(k3, (Cout,), jnp.float32, -bound, bound)
    gamma = 1.0 + 0.1 * jax.random.normal(k4, (Cout,), jnp.float32)
    beta = 0.1 * jax.random.normal(k5, (Cout,), jnp.float32)

    fwd = jax.jit(functools.partial(backbone_block_forward, stride=stride, padding=padding))
    out = jax.block_until_ready(fwd(x, conv_w, conv_b, gamma, beta))

    assert out.shape == (N, Cout, H, W), out.shape
    # Tight check against a reference that matches the kernel's bf16 matmul precision.
    ref_bf16 = _reference(x, conv_w, conv_b, gamma, beta, stride, padding,
                          conv_dtype=jnp.bfloat16)
    assert jnp.allclose(out, ref_bf16, atol=2e-3, rtol=2e-3), \
        float(jnp.max(jnp.abs(out - ref_bf16)))
    # Loose sanity check against the pure-f32 PyTorch-equivalent reference.
    ref_f32 = _reference(x, conv_w, conv_b, gamma, beta, stride, padding,
                         conv_dtype=jnp.float32)
    assert jnp.allclose(out, ref_f32, atol=1e-1), \
        float(jnp.max(jnp.abs(out - ref_f32)))
    print("KERNEL_OK")
</pallas_src>

<mosaic_0001>
module attributes {stable_mosaic.version = 11 : i64} {
  func.func @_conv_stats_kernel(%arg0: i32, %arg1: i32, %arg2: memref<512x128xbf16, #tpu.memory_space<vmem>>, %arg3: memref<128x128xbf16, #tpu.memory_space<vmem>>, %arg4: memref<512x128xf32, #tpu.memory_space<vmem>>, %arg5: memref<1x1x128xf32, #tpu.memory_space<vmem>>, %arg6: memref<1x1x128xf32, #tpu.memory_space<vmem>>) attributes {dimension_semantics = [#tpu.dimension_semantics<parallel>, #tpu.dimension_semantics<arbitrary>], iteration_bounds = array<i64: 2, 2>, scalar_prefetch = 0 : i64, scratch_operands = 0 : i64, tpu.core_type = #tpu.core_type<tc>, window_params = [{transform_indices = @transform_0, window_bounds = array<i64: 512, 128>}, {pipeline_mode = #tpu.pipeline_mode<synchronous>, transform_indices = @transform_1, window_bounds = array<i64: 128, 128>}, {transform_indices = @transform_2, window_bounds = array<i64: 512, 128>}, {transform_indices = @transform_3, window_bounds = array<i64: 1, 1, 128>}, {transform_indices = @transform_4, window_bounds = array<i64: 1, 1, 128>}]} {
    %c0 = arith.constant 0 : index
    %c0_0 = arith.constant 0 : index
    %0 = vector.load %arg2[%c0, %c0_0] : memref<512x128xbf16, #tpu.memory_space<vmem>>, vector<512x128xbf16>
    %c0_1 = arith.constant 0 : index
    %c0_2 = arith.constant 0 : index
    %1 = vector.load %arg3[%c0_1, %c0_2] : memref<128x128xbf16, #tpu.memory_space<vmem>>, vector<128x128xbf16>
    %cst = arith.constant dense<0.000000e+00> : vector<512x128xf32>
    %2 = tpu.matmul %0, %1, %cst {dimension_numbers = #tpu.dot_dimension_numbers<[1], [0], [0], [1], [0, 0, 1, 1], [], []>} : vector<512x128xbf16>, vector<128x128xbf16>, vector<512x128xf32> -> vector<512x128xf32>
    %c0_3 = arith.constant 0 : index
    %c0_4 = arith.constant 0 : index
    %3 = vector.load %arg4[%c0_3, %c0_4] : memref<512x128xf32, #tpu.memory_space<vmem>>, vector<512x128xf32>
    tpu.vector_store %arg4[%c0_3, %c0_4], %2 {strides = array<i32>} : memref<512x128xf32, #tpu.memory_space<vmem>>, vector<512x128xf32>,
    %c0_i32 = arith.constant 0 : i32
    %4 = arith.cmpi eq, %arg1, %c0_i32 : i32
    %5 = arith.extui %4 : i1 to i32
    %c0_i32_5 = arith.constant 0 : i32
    %6 = arith.cmpi ne, %5, %c0_i32_5 : i32
    scf.if %6 {
      %cst_20 = arith.constant 0.000000e+00 : f32
      %18 = vector.broadcast %cst_20 : f32 to vector<1x1x128xf32>
      %c0_21 = arith.constant 0 : index
      %c0_22 = arith.constant 0 : index
      %c0_23 = arith.constant 0 : index
      %19 = vector.load %arg5[%c0_21, %c0_22, %c0_23] : memref<1x1x128xf32, #tpu.memory_space<vmem>>, vector<1x1x128xf32>
      tpu.vector_store %arg5[%c0_21, %c0_22, %c0_23], %18 {strides = array<i32>} : memref<1x1x128xf32, #tpu.memory_space<vmem>>, vector<1x1x128xf32>,
      %cst_24 = arith.constant 0.000000e+00 : f32
      %20 = vector.broadcast %cst_24 : f32 to vector<1x1x128xf32>
      %c0_25 = arith.constant 0 : index
      %c0_26 = arith.constant 0 : index
      %c0_27 = arith.constant 0 : index
      %21 = vector.load %arg6[%c0_25, %c0_26, %c0_27] : memref<1x1x128xf32, #tpu.memory_space<vmem>>, vector<1x1x128xf32>
      tpu.vector_store %arg6[%c0_25, %c0_26, %c0_27], %20 {strides = array<i32>} : memref<1x1x128xf32, #tpu.memory_space<vmem>>, vector<1x1x128xf32>,
    } else {
    }
    %c0_6 = arith.constant 0 : index
    %c0_7 = arith.constant 0 : index
    %c0_8 = arith.constant 0 : index
    %7 = vector.load %arg5[%c0_6, %c0_7, %c0_8] : memref<1x1x128xf32, #tpu.memory_space<vmem>>, vector<1x1x128xf32>
    %cst_9 = arith.constant dense<0.000000e+00> : vector<128xf32>
    %8 = vector.multi_reduction <add>, %2, %cst_9 [0] : vector<512x128xf32> to vector<128xf32>
    %9 = vector.shape_cast %8 : vector<128xf32> to vector<1x1x128xf32>
    %10 = arith.addf %7, %9 : vector<1x1x128xf32>
    %c0_10 = arith.constant 0 : index
    %c0_11 = arith.constant 0 : index
    %c0_12 = arith.constant 0 : index
    %11 = vector.load %arg5[%c0_10, %c0_11, %c0_12] : memref<1x1x128xf32, #tpu.memory_space<vmem>>, vector<1x1x128xf32>
    tpu.vector_store %arg5[%c0_10, %c0_11, %c0_12], %10 {strides = array<i32>} : memref<1x1x128xf32, #tpu.memory_space<vmem>>, vector<1x1x128xf32>,
    %c0_13 = arith.constant 0 : index
    %c0_14 = arith.constant 0 : index
    %c0_15 = arith.constant 0 : index
    %12 = vector.load %arg6[%c0_13, %c0_14, %c0_15] : memref<1x1x128xf32, #tpu.memory_space<vmem>>, vector<1x1x128xf32>
    %13 = arith.mulf %2, %2 : vector<512x128xf32>
    %cst_16 = arith.constant dense<0.000000e+00> : vector<128xf32>
    %14 = vector.multi_reduction <add>, %13, %cst_16 [0] : vector<512x128xf32> to vector<128xf32>
    %15 = vector.shape_cast %14 : vector<128xf32> to vector<1x1x128xf32>
    %16 = arith.addf %12, %15 : vector<1x1x128xf32>
    %c0_17 = arith.constant 0 : index
    %c0_18 = arith.constant 0 : index
    %c0_19 = arith.constant 0 : index
    %17 = vector.load %arg6[%c0_17, %c0_18, %c0_19] : memref<1x1x128xf32, #tpu.memory_space<vmem>>, vector<1x1x128xf32>
    tpu.vector_store %arg6[%c0_17, %c0_18, %c0_19], %16 {strides = array<i32>} : memref<1x1x128xf32, #tpu.memory_space<vmem>>, vector<1x1x128xf32>,
    return
  }
  func.func @transform_0(%arg0: i32, %arg1: i32) -> (i32, i32) {
    %c2_i32 = arith.constant 2 : i32
    %0 = arith.muli %arg0, %c2_i32 : i32
    %1 = arith.addi %0, %arg1 : i32
    %c0_i32 = arith.constant 0 : i32
    %c0_i32_0 = arith.constant 0 : i32
    return %1, %c0_i32 : i32, i32
  }
  func.func @transform_1(%arg0: i32, %arg1: i32) -> (i32, i32) {
    %c0_i32 = arith.constant 0 : i32
    %c0_i32_0 = arith.constant 0 : i32
    %c0_i32_1 = arith.constant 0 : i32
    return %c0_i32, %c0_i32_0 : i32, i32
  }
  func.func @transform_2(%arg0: i32, %arg1: i32) -> (i32, i32) {
    %c2_i32 = arith.constant 2 : i32
    %0 = arith.muli %arg0, %c2_i32 : i32
    %1 = arith.addi %0, %arg1 : i32
    %c0_i32 = arith.constant 0 : i32
    %c0_i32_0 = arith.constant 0 : i32
    return %1, %c0_i32 : i32, i32
  }
  func.func @transform_3(%arg0: i32, %arg1: i32) -> (i32, i32, i32) {
    %c0_i32 = arith.constant 0 : i32
    %c0_i32_0 = arith.constant 0 : i32
    %c0_i32_1 = arith.constant 0 : i32
    return %arg0, %c0_i32, %c0_i32_0 : i32, i32, i32
  }
  func.func @transform_4(%arg0: i32, %arg1: i32) -> (i32, i32, i32) {
    %c0_i32 = arith.constant 0 : i32
    %c0_i32_0 = arith.constant 0 : i32
    %c0_i32_1 = arith.constant 0 : i32
    return %arg0, %c0_i32, %c0_i32_0 : i32, i32, i32
  }
}

module attributes {stable_mosaic.version = 11 : i64} {
  func.func @_bn_relu_kernel(%arg0: i32, %arg1: memref<512x128xf32, #tpu.memory_space<vmem>>, %arg2: memref<1x128xf32, #tpu.memory_space<vmem>>, %arg3: memref<1x128xf32, #tpu.memory_space<vmem>>, %arg4: memref<512x128xf32, #tpu.memory_space<vmem>>) attributes {dimension_semantics = [#tpu.dimension_semantics<parallel>], iteration_bounds = array<i64: 4>, scalar_prefetch = 0 : i64, scratch_operands = 0 : i64, tpu.core_type = #tpu.core_type<tc>, window_params = [{transform_indices = @transform_0, window_bounds = array<i64: 512, 128>}, {pipeline_mode = #tpu.pipeline_mode<synchronous>, transform_indices = @transform_1, window_bounds = array<i64: 1, 128>}, {pipeline_mode = #tpu.pipeline_mode<synchronous>, transform_indices = @transform_2, window_bounds = array<i64: 1, 128>}, {transform_indices = @transform_3, window_bounds = array<i64: 512, 128>}]} {
    %c0 = arith.constant 0 : index
    %c0_0 = arith.constant 0 : index
    %0 = vector.load %arg1[%c0, %c0_0] : memref<512x128xf32, #tpu.memory_space<vmem>>, vector<512x128xf32>
    %c0_1 = arith.constant 0 : index
    %c0_2 = arith.constant 0 : index
    %1 = vector.load %arg2[%c0_1, %c0_2] : memref<1x128xf32, #tpu.memory_space<vmem>>, vector<1x128xf32>
    %2 = vector.broadcast %1 : vector<1x128xf32> to vector<512x128xf32>
    %3 = arith.mulf %0, %2 : vector<512x128xf32>
    %c0_3 = arith.constant 0 : index
    %c0_4 = arith.constant 0 : index
    %4 = vector.load %arg3[%c0_3, %c0_4] : memref<1x128xf32, #tpu.memory_space<vmem>>, vector<1x128xf32>
    %5 = vector.broadcast %4 : vector<1x128xf32> to vector<512x128xf32>
    %6 = arith.addf %3, %5 : vector<512x128xf32>
    %cst = arith.constant 0.000000e+00 : f32
    %7 = vector.broadcast %cst : f32 to vector<512x128xf32>
    %8 = arith.maximumf %6, %7 : vector<512x128xf32>
    %c0_5 = arith.constant 0 : index
    %c0_6 = arith.constant 0 : index
    %9 = vector.load %arg4[%c0_5, %c0_6] : memref<512x128xf32, #tpu.memory_space<vmem>>, vector<512x128xf32>
    tpu.vector_store %arg4[%c0_5, %c0_6], %8 {strides = array<i32>} : memref<512x128xf32, #tpu.memory_space<vmem>>, vector<512x128xf32>,
    return
  }
  func.func @transform_0(%arg0: i32) -> (i32, i32) {
    %c0_i32 = arith.constant 0 : i32
    %c0_i32_0 = arith.constant 0 : i32
    return %arg0, %c0_i32 : i32, i32
  }
  func.func @transform_1(%arg0: i32) -> (i32, i32) {
    %c0_i32 = arith.constant 0 : i32
    %c0_i32_0 = arith.constant 0 : i32
    %c0_i32_1 = arith.constant 0 : i32
    return %c0_i32, %c0_i32_0 : i32, i32
  }
  func.func @transform_2(%arg0: i32) -> (i32, i32) {
    %c0_i32 = arith.constant 0 : i32
    %c0_i32_0 = arith.constant 0 : i32
    %c0_i32_1 = arith.constant 0 : i32
    return %c0_i32, %c0_i32_0 : i32, i32
  }
  func.func @transform_3(%arg0: i32) -> (i32, i32) {
    %c0_i32 = arith.constant 0 : i32
    %c0_i32_0 = arith.constant 0 : i32
    return %arg0, %c0_i32 : i32, i32
  }
}

</mosaic_0001>

<bundles_post_ra>
// kernel: backbone_block_forward.3
= control target key start
LH: loop header
LB: loop body
LE: loop exit
PB: predicated region body
PF: predicated region fallthrough
CT: control target
= control target key end

     0   :  { %s607_s12 = smov 0   ;;  %s1086_s0 = inlined_call_operand.vmem [shape: f32[2048,128], index: 0, kind: input, shape index: {}, may-alias: {0,3}]   ;;  %s1087_s1 = inlined_call_operand.vmem [shape: f32[1,128], index: 1, kind: input, shape index: {}]   ;;  %s1088_s2 = inlined_call_operand.vmem [shape: f32[1,128], index: 2, kind: input, shape index: {}]   ;;  %s1089_s3 = inlined_call_operand.vmem [shape: f32[2048,128], index: 3, kind: output, shape index: {}, may-alias: {0,3}]  }
   0x1 LB: > { %s558_s13 = sadd.s32 4294967295, %s585_s12   ;;  %p562_p0 = scmp.ge.s32.totalorder %s585_s12, 1  ;;  %s585_s12 = sphi %s607_s12, %s13_s12  }
   0x2   : > { %p138_p1 = scmp.lt.s32.totalorder %s585_s12, 5 }
   0x4   : > { %p139_p2 = pnand %p562_p0, %p138_p1 }
   0x6   : > { %142 = sbr.rel (%p139_p2) target bundleno = 108 (0x6c), region = 32 }
   0xb   : > { %s563_s14 = sshll.u32 %s558_s13, 6  ;;  %v628_v0 = vld [vmem:[%s1087_s1] ss:$0 sm:$0xff] }
   0xc   : > { %p163_p3 = scmp.lt.s32.totalorder %s563_s14, 255  ;;  %v638_v6 = vld [vmem:[%s1088_s2] ss:$0 sm:$0xff] }
   0xe   : > { %s1110_s14 = smov (!%p163_p3, %s563_s14), 255 }
   0xf   : > { %s564_s15 = sshll.u32 %s1110_s14, 3 }
  0x10   : > { %s623_s18 = scalar_lea.vmem %s1086_s0, %s564_s15  ;;  %s689_s25 = scalar_lea.vmem %s1089_s3, %s564_s15 }
  0x11   : > { %v174_v1 = vld [vmem:[%s623_s18] sm:$0xff]  ;;  %v175_v2 = vld [vmem:[%s623_s18 + $0x8] sm:$0xff]  ;;  %v176_v3 = vld [vmem:[%s623_s18 + $0x10] sm:$0xff] }
  0x12   : > { %v177_v4 = vld [vmem:[%s623_s18 + $0x18] sm:$0xff]  ;;  %v242_v5 = vmul.f32 %v628_v0, %v174_v1  ;;  %v178_v7 = vld [vmem:[%s623_s18 + $0x20] sm:$0xff]  ;;  %v243_v8 = vmul.f32 %v628_v0, %v175_v2  ;;  %v179_v9 = vld [vmem:[%s623_s18 + $0x28] sm:$0xff]  ;;  %v244_v10 = vmul.f32 %v628_v0, %v176_v3 }
  0x13   : > { %v180_v11 = vld [vmem:[%s623_s18 + $0x30] sm:$0xff]  ;;  %v245_v12 = vmul.f32 %v628_v0, %v177_v4  ;;  %v181_v13 = vld [vmem:[%s623_s18 + $0x38] sm:$0xff]  ;;  %v246_v15 = vmul.f32 %v628_v0, %v178_v7  ;;  %v182_v16 = vld [vmem:[%s623_s18 + $0x40] sm:$0xff]  ;;  %v247_v18 = vmul.f32 %v628_v0, %v179_v9 }
  0x14   : > { %v648_v14 = vadd.f32 %v638_v6, %v242_v5  ;;  %v653_v17 = vadd.f32 %v638_v6, %v243_v8  ;;  %v183_v19 = vld [vmem:[%s623_s18 + $0x48] sm:$0xff]  ;;  %v658_v20 = vadd.f32 %v638_v6, %v244_v10  ;;  %v248_v21 = vmul.f32 %v628_v0, %v180_v11  ;;  %v184_v22 = vld [vmem:[%s623_s18 + $0x50] sm:$0xff]  ;;  %v669_v25 = vld [vmem:[%s623_s18 + $0x58] sm:$0xff] }
  0x15   : > { %v663_v23 = vadd.f32 %v638_v6, %v245_v12  ;;  %v666_v24 = vmul.f32 %v628_v0, %v181_v13  ;;  %v672_v26 = vld [vmem:[%s623_s18 + $0x60] sm:$0xff]  ;;  %v675_v27 = vld [vmem:[%s623_s18 + $0x68] sm:$0xff]  ;;  %v679_v29 = vadd.f32 %v638_v6, %v246_v15  ;;  %v682_v30 = vmul.f32 %v628_v0, %v182_v16  ;;  %v692_v31 = vld [vmem:[%s623_s18 + $0x70] sm:$0xff] }
  0x16   : > { %v695_v32 = vld [vmem:[%s623_s18 + $0x78] sm:$0xff]  ;;  %v698_v33 = vld [vmem:[%s623_s18 + $0x80] sm:$0xff]  ;;  %v701_v34 = vld [vmem:[%s623_s18 + $0x88] sm:$0xff]  ;;  %v375_v13 = vmax.f32 %v653_v17, 0.0  ;;  %v315_v15 = vadd.f32 %v638_v6, %v247_v18  ;;  %v251_v16 = vmul.f32 %v628_v0, %v183_v19 }
  0x17   : > { %v704_v35 = vld [vmem:[%s623_s18 + $0x90] sm:$0xff]  ;;  %v707_v36 = vld [vmem:[%s623_s18 + $0x98] sm:$0xff]  ;;  %v710_v37 = vld [vmem:[%s623_s18 + $0xa0] sm:$0xff]  ;;  %v377_v19 = vmax.f32 %v663_v23, 0.0 }
  0x18   : > { %v713_v38 = vld [vmem:[%s623_s18 + $0xa8] sm:$0xff]  ;;  %v716_v39 = vld [vmem:[%s623_s18 + $0xb0] sm:$0xff]  ;;  %v719_v40 = vld [vmem:[%s623_s18 + $0xb8] sm:$0xff]  ;;  %v379_v23 = vmax.f32 %v315_v15, 0.0 }
  0x19   : > { %v722_v41 = vld [vmem:[%s623_s18 + $0xc0] sm:$0xff]  ;;  %v725_v42 = vld [vmem:[%s623_s18 + $0xc8] sm:$0xff]  ;;  %v728_v43 = vld [vmem:[%s623_s18 + $0xd0] sm:$0xff] }
  0x1a   : > { %v731_v44 = vld [vmem:[%s623_s18 + $0xd8] sm:$0xff]  ;;  %v734_v45 = vld [vmem:[%s623_s18 + $0xe0] sm:$0xff]  ;;  %v737_v46 = vld [vmem:[%s623_s18 + $0xe8] sm:$0xff] }
  0x1b   : > { %v740_v47 = vld [vmem:[%s623_s18 + $0xf0] sm:$0xff]  ;;  %v743_v48 = vld [vmem:[%s623_s18 + $0xf8] sm:$0xff]  ;;  %v746_v49 = vld [vmem:[%s623_s18 + $0x100] sm:$0xff] }
  0x1c   : > { %v749_v50 = vld [vmem:[%s623_s18 + $0x108] sm:$0xff]  ;;  %v752_v51 = vld [vmem:[%s623_s18 + $0x110] sm:$0xff]  ;;  %v755_v52 = vld [vmem:[%s623_s18 + $0x118] sm:$0xff] }
  0x1d   : > { %v758_v53 = vld [vmem:[%s623_s18 + $0x120] sm:$0xff]  ;;  %v761_v54 = vld [vmem:[%s623_s18 + $0x128] sm:$0xff]  ;;  %v764_v55 = vld [vmem:[%s623_s18 + $0x130] sm:$0xff] }
  0x1e   : > { %v767_v56 = vld [vmem:[%s623_s18 + $0x138] sm:$0xff]  ;;  %v770_v57 = vld [vmem:[%s623_s18 + $0x140] sm:$0xff]  ;;  %v773_v58 = vld [vmem:[%s623_s18 + $0x148] sm:$0xff] }
  0x1f   : > { %v776_v59 = vld [vmem:[%s623_s18 + $0x150] sm:$0xff]  ;;  %v779_v60 = vld [vmem:[%s623_s18 + $0x158] sm:$0xff]  ;;  %v782_v61 = vld [vmem:[%s623_s18 + $0x160] sm:$0xff] }
  0x20   : > { %v785_v62 = vld [vmem:[%s623_s18 + $0x168] sm:$0xff]  ;;  %v788_v63 = vld [vmem:[%s623_s18 + $0x170] sm:$0xff]  ;;  %v791_v1 = vld [vmem:[%s623_s18 + $0x178] sm:$0xff] }
  0x21   : > { %v794_v2 = vld [vmem:[%s623_s18 + $0x180] sm:$0xff]  ;;  %v797_v3 = vld [vmem:[%s623_s18 + $0x188] sm:$0xff]  ;;  %v800_v4 = vld [vmem:[%s623_s18 + $0x190] sm:$0xff] }
  0x22   : > { %v803_v5 = vld [vmem:[%s623_s18 + $0x198] sm:$0xff]  ;;  %v806_v7 = vld [vmem:[%s623_s18 + $0x1a0] sm:$0xff]  ;;  %v809_v8 = vld [vmem:[%s623_s18 + $0x1a8] sm:$0xff] }
  0x23   : > { %1090 = vst [vmem:[#allocation2_spill] sm:$0xff] %v806_v7  ;;  %v812_v9 = vld [vmem:[%s623_s18 + $0x1b0] sm:$0xff]  ;;  %v815_v10 = vld [vmem:[%s623_s18 + $0x1b8] sm:$0xff]  ;;  %v818_v11 = vld [vmem:[%s623_s18 + $0x1c0] sm:$0xff] }
  0x24   : > { %1091 = vst [vmem:[#allocation3_spill] sm:$0xff] %v809_v8  ;;  %v821_v12 = vld [vmem:[%s623_s18 + $0x1c8] sm:$0xff]  ;;  %v827_v28 = vld [vmem:[%s623_s18 + $0x1d0] sm:$0xff]  ;;  %v830_v8 = vld [vmem:[%s623_s18 + $0x1d8] sm:$0xff] }
  0x25   : > { %1092 = vst [vmem:[#allocation4_spill] sm:$0xff] %v812_v9  ;;  %v833_v7 = vld [vmem:[%s623_s18 + $0x1e0] sm:$0xff]  ;;  %v839_v9 = vld [vmem:[%s623_s18 + $0x1e8] sm:$0xff]  ;;  %v842_v17 = vld [vmem:[%s623_s18 + $0x1f0] sm:$0xff] }
  0x26   : > { %1093 = vst [vmem:[#allocation5_spill] sm:$0xff] %v815_v10  ;;  %v376_v10 = vmax.f32 %v658_v20, 0.0  ;;  %v845_v18 = vld [vmem:[%s623_s18 + $0x1f8] sm:$0xff]  ;;  %v253_v20 = vmul.f32 %v628_v0, %v669_v25  ;;  %v255_v25 = vmul.f32 %v628_v0, %v675_v27 }
  0x27   : > { %1094 = vst [vmem:[#allocation6_spill] sm:$0xff] %v818_v11  ;;  %v316_v11 = vadd.f32 %v638_v6, %v248_v21  ;;  %v1099_v21 = vmax.f32 %v648_v14, 0.0 }
  0x28   : > { %1095 = vst [vmem:[#allocation7_spill] sm:$0xff] %v821_v12  ;;  %v252_v12 = vmul.f32 %v628_v0, %v184_v22  ;;  %v378_v22 = vmax.f32 %v679_v29, 0.0  ;;  %v256_v29 = vmul.f32 %v628_v0, %v692_v31  ;;  %v323_v31 = vadd.f32 %v638_v6, %v255_v25 }
  0x29   : > { %1096 = vst [vmem:[#allocation8_spill] sm:$0xff] %v830_v8  ;;  %v317_v8 = vadd.f32 %v638_v6, %v666_v24  ;;  %v319_v24 = vadd.f32 %v638_v6, %v251_v16  ;;  %v380_v14 = vmax.f32 %v316_v11, 0.0  ;;  %v260_v16 = vmul.f32 %v628_v0, %v704_v35 }
  0x2a   : > { %1097 = vst [vmem:[#allocation9_spill] sm:$0xff] %v839_v9  ;;  %v254_v9 = vmul.f32 %v628_v0, %v672_v26  ;;  %v321_v26 = vadd.f32 %v638_v6, %v253_v20  ;;  %v262_v20 = vmul.f32 %v628_v0, %v710_v37  ;;  %v264_v25 = vmul.f32 %v628_v0, %v716_v39 }
  0x2b   : > { %1098 = vst [vmem:[#allocation10_spill] sm:$0xff] %v842_v17  ;;  %v318_v17 = vadd.f32 %v638_v6, %v682_v30  ;;  %v381_v30 = vmax.f32 %v317_v8, 0.0  ;;  %v383_v11 = vmax.f32 %v319_v24, 0.0  ;;  %v259_v8 = vmul.f32 %v628_v0, %v701_v34 }
  0x2c   : > { %438 = vst [vmem:[%s689_s25] sm:$0xff] %v1099_v21  ;;  %v320_v21 = vadd.f32 %v638_v6, %v252_v12  ;;  %v322_v27 = vadd.f32 %v638_v6, %v254_v9  ;;  %v385_v9 = vmax.f32 %v321_v26, 0.0 }
  0x2d   : > { %439 = vst [vmem:[%s689_s25 + $0x8] sm:$0xff] %v375_v13  ;;  %v257_v13 = vmul.f32 %v628_v0, %v695_v32  ;;  %v382_v15 = vmax.f32 %v318_v17, 0.0  ;;  %v324_v32 = vadd.f32 %v638_v6, %v256_v29  ;;  %v261_v17 = vmul.f32 %v628_v0, %v707_v36 }
  0x2e   : > { %440 = vst [vmem:[%s689_s25 + $0x10] sm:$0xff] %v376_v10  ;;  %v258_v10 = vmul.f32 %v628_v0, %v698_v33  ;;  %v384_v12 = vmax.f32 %v320_v21, 0.0  ;;  %v327_v35 = vadd.f32 %v638_v6, %v259_v8  ;;  %v328_v36 = vadd.f32 %v638_v6, %v260_v16 }
  0x2f   : > { %441 = vst [vmem:[%s689_s25 + $0x18] sm:$0xff] %v377_v19  ;;  %v325_v33 = vadd.f32 %v638_v6, %v257_v13  ;;  %v386_v19 = vmax.f32 %v322_v27, 0.0  ;;  %v388_v24 = vmax.f32 %v324_v32, 0.0  ;;  %v329_v37 = vadd.f32 %v638_v6, %v261_v17 }
  0x30   : > { %442 = vst [vmem:[%s689_s25 + $0x20] sm:$0xff] %v378_v22  ;;  %v326_v34 = vadd.f32 %v638_v6, %v258_v10  ;;  %v387_v22 = vmax.f32 %v323_v31, 0.0  ;;  %v265_v21 = vmul.f32 %v628_v0, %v719_v40  ;;  %v391_v26 = vmax.f32 %v327_v35, 0.0 }
  0x31   : > { %443 = vst [vmem:[%s689_s25 + $0x28] sm:$0xff] %v379_v23  ;;  %v263_v23 = vmul.f32 %v628_v0, %v713_v38  ;;  %v330_v38 = vadd.f32 %v638_v6, %v262_v20  ;;  %v267_v13 = vmul.f32 %v628_v0, %v725_v42  ;;  %v332_v40 = vadd.f32 %v638_v6, %v264_v25 }
  0x32   : > { %444 = vst [vmem:[%s689_s25 + $0x30] sm:$0xff] %v380_v14  ;;  %v389_v14 = vmax.f32 %v325_v33, 0.0  ;;  %v390_v29 = vmax.f32 %v326_v34, 0.0  ;;  %v268_v27 = vmul.f32 %v628_v0, %v728_v43  ;;  %v393_v10 = vmax.f32 %v329_v37, 0.0 }
  0x33   : > { %445 = vst [vmem:[%s689_s25 + $0x38] sm:$0xff] %v381_v30  ;;  %v266_v30 = vmul.f32 %v628_v0, %v722_v41  ;;  %v331_v39 = vadd.f32 %v638_v6, %v263_v23  ;;  %v333_v41 = vadd.f32 %v638_v6, %v265_v21  ;;  %v394_v31 = vmax.f32 %v330_v38, 0.0 }
  0x34   : > { %446 = vst [vmem:[%s689_s25 + $0x40] sm:$0xff] %v382_v15  ;;  %v392_v15 = vmax.f32 %v328_v36, 0.0  ;;  %v270_v8 = vmul.f32 %v628_v0, %v734_v45  ;;  %v335_v43 = vadd.f32 %v638_v6, %v267_v13  ;;  %v271_v32 = vmul.f32 %v628_v0, %v737_v46 }
  0x35   : > { %447 = vst [vmem:[%s689_s25 + $0x48] sm:$0xff] %v383_v11  ;;  %v269_v11 = vmul.f32 %v628_v0, %v731_v44  ;;  %v334_v42 = vadd.f32 %v638_v6, %v266_v30  ;;  %v396_v16 = vmax.f32 %v332_v40, 0.0  ;;  %v336_v44 = vadd.f32 %v638_v6, %v268_v27 }
  0x36   : > { %448 = vst [vmem:[%s689_s25 + $0x50] sm:$0xff] %v384_v12  ;;  %v395_v12 = vmax.f32 %v331_v39, 0.0  ;;  %v397_v33 = vmax.f32 %v333_v41, 0.0  ;;  %v273_v17 = vmul.f32 %v628_v0, %v743_v48  ;;  %v338_v46 = vadd.f32 %v638_v6, %v270_v8 }
  0x37   : > { %449 = vst [vmem:[%s689_s25 + $0x58] sm:$0xff] %v385_v9  ;;  %v272_v9 = vmul.f32 %v628_v0, %v740_v47  ;;  %v337_v45 = vadd.f32 %v638_v6, %v269_v11  ;;  %v274_v34 = vmul.f32 %v628_v0, %v746_v49  ;;  %v399_v20 = vmax.f32 %v335_v43, 0.0 }
  0x38   : > { %450 = vst [vmem:[%s689_s25 + $0x60] sm:$0xff] %v386_v19  ;;  %v398_v19 = vmax.f32 %v334_v42, 0.0  ;;  %v339_v47 = vadd.f32 %v638_v6, %v271_v32  ;;  %v400_v35 = vmax.f32 %v336_v44, 0.0  ;;  %v276_v23 = vmul.f32 %v628_v0, %v752_v51 }
  0x39   : > { %451 = vst [vmem:[%s689_s25 + $0x68] sm:$0xff] %v387_v22  ;;  %v275_v22 = vmul.f32 %v628_v0, %v749_v50  ;;  %v340_v48 = vadd.f32 %v638_v6, %v272_v9  ;;  %v341_v49 = vadd.f32 %v638_v6, %v273_v17  ;;  %v277_v36 = vmul.f32 %v628_v0, %v755_v52 }
  0x3a   : > { %452 = vst [vmem:[%s689_s25 + $0x70] sm:$0xff] %v388_v24  ;;  %v401_v24 = vmax.f32 %v337_v45, 0.0  ;;  %v402_v25 = vmax.f32 %v338_v46, 0.0  ;;  %v342_v50 = vadd.f32 %v638_v6, %v274_v34  ;;  %v305_v37 = vmul.f32 %v628_v0, %v845_v18 }
  0x3b   : > { %453 = vst [vmem:[%s689_s25 + $0x78] sm:$0xff] %v389_v14  ;;  %v278_v14 = vmul.f32 %v628_v0, %v758_v53  ;;  %v403_v51 = vmax.f32 %v339_v47, 0.0  ;;  %v343_v21 = vadd.f32 %v638_v6, %v275_v22  ;;  %v404_v52 = vmax.f32 %v340_v48, 0.0 }
  0x3c   : > { %454 = vst [vmem:[%s689_s25 + $0x80] sm:$0xff] %v390_v29  ;;  %v279_v29 = vmul.f32 %v628_v0, %v761_v54  ;;  %v344_v38 = vadd.f32 %v638_v6, %v276_v23  ;;  %v280_v30 = vmul.f32 %v628_v0, %v764_v55  ;;  %v967_v53 = vadd.f32 %v638_v6, %v305_v37 }
  0x3d   : > { %455 = vst [vmem:[%s689_s25 + $0x88] sm:$0xff] %v391_v26  ;;  %v405_v18 = vmax.f32 %v341_v49, 0.0  ;;  %v345_v26 = vadd.f32 %v638_v6, %v277_v36  ;;  %v281_v39 = vmul.f32 %v628_v0, %v767_v56  ;;  %v406_v54 = vmax.f32 %v342_v50, 0.0 }
  0x3e   : > { %456 = vst [vmem:[%s689_s25 + $0x90] sm:$0xff] %v392_v15  ;;  %v346_v13 = vadd.f32 %v638_v6, %v278_v14  ;;  %v282_v15 = vmul.f32 %v628_v0, %v770_v57  ;;  %v407_v55 = vmax.f32 %v343_v21, 0.0  ;;  %v347_v40 = vadd.f32 %v638_v6, %v279_v29 }
  0x3f   : > { %457 = vst [vmem:[%s689_s25 + $0x98] sm:$0xff] %v393_v10  ;;  %v283_v27 = vmul.f32 %v628_v0, %v773_v58  ;;  %v408_v10 = vmax.f32 %v344_v38, 0.0  ;;  %v348_v56 = vadd.f32 %v638_v6, %v280_v30  ;;  %v284_v41 = vmul.f32 %v628_v0, %v776_v59  ;;  %v1104_v38 = vld [vmem:[#allocation6_spill] sm:$0xff] }
  0x40   : > { %458 = vst [vmem:[%s689_s25 + $0xa0] sm:$0xff] %v394_v31  ;;  %v409_v11 = vmax.f32 %v345_v26, 0.0  ;;  %v349_v57 = vadd.f32 %v638_v6, %v281_v39  ;;  %v285_v31 = vmul.f32 %v628_v0, %v779_v60  ;;  %v410_v42 = vmax.f32 %v346_v13, 0.0  ;;  %v1105_v39 = vld [vmem:[#allocation7_spill] sm:$0xff] }
  0x41   : > { %459 = vst [vmem:[%s689_s25 + $0xa8] sm:$0xff] %v395_v12  ;;  %v350_v58 = vadd.f32 %v638_v6, %v282_v15  ;;  %v286_v8 = vmul.f32 %v628_v0, %v782_v61  ;;  %v411_v12 = vmax.f32 %v347_v40, 0.0  ;;  %v351_v59 = vadd.f32 %v638_v6, %v283_v27 }
  0x42   : > { %460 = vst [vmem:[%s689_s25 + $0xb0] sm:$0xff] %v396_v16  ;;  %v287_v43 = vmul.f32 %v628_v0, %v785_v62  ;;  %v412_v32 = vmax.f32 %v348_v56, 0.0  ;;  %v352_v60 = vadd.f32 %v638_v6, %v284_v41  ;;  %v288_v16 = vmul.f32 %v628_v0, %v788_v63 }
  0x43   : > { %461 = vst [vmem:[%s689_s25 + $0xb8] sm:$0xff] %v397_v33  ;;  %v413_v44 = vmax.f32 %v349_v57, 0.0  ;;  %v353_v61 = vadd.f32 %v638_v6, %v285_v31  ;;  %v289_v9 = vmul.f32 %v628_v0, %v791_v1  ;;  %v414_v33 = vmax.f32 %v350_v58, 0.0 }
  0x44   : > { %462 = vst [vmem:[%s689_s25 + $0xc0] sm:$0xff] %v398_v19  ;;  %v354_v62 = vadd.f32 %v638_v6, %v286_v8  ;;  %v290_v45 = vmul.f32 %v628_v0, %v794_v2  ;;  %v415_v17 = vmax.f32 %v351_v59, 0.0  ;;  %v355_v63 = vadd.f32 %v638_v6, %v287_v43  ;;  %v1108_v59 = vld [vmem:[#allocation10_spill] sm:$0xff] }
  0x45   : > { %463 = vst [vmem:[%s689_s25 + $0xc8] sm:$0xff] %v399_v20  ;;  %v291_v19 = vmul.f32 %v628_v0, %v797_v3  ;;  %v416_v46 = vmax.f32 %v352_v60, 0.0  ;;  %v356_v1 = vadd.f32 %v638_v6, %v288_v16  ;;  %v292_v34 = vmul.f32 %v628_v0, %v800_v4 }
  0x46   : > { %464 = vst [vmem:[%s689_s25 + $0xd0] sm:$0xff] %v400_v35  ;;  %v417_v20 = vmax.f32 %v353_v61, 0.0  ;;  %v357_v2 = vadd.f32 %v638_v6, %v289_v9  ;;  %v293_v47 = vmul.f32 %v628_v0, %v803_v5  ;;  %v418_v22 = vmax.f32 %v354_v62, 0.0  ;;  %v1100_v35 = vld [vmem:[#allocation2_spill] sm:$0xff] }
  0x47   : > { %465 = vst [vmem:[%s689_s25 + $0xd8] sm:$0xff] %v401_v24  ;;  %v358_v3 = vadd.f32 %v638_v6, %v290_v45  ;;  %v294_v48 = vmul.f32 %v628_v0, %v1100_v35  ;;  %v419_v23 = vmax.f32 %v355_v63, 0.0  ;;  %v359_v4 = vadd.f32 %v638_v6, %v291_v19  ;;  %v1101_v24 = vld [vmem:[#allocation3_spill] sm:$0xff] }
  0x48   : > { %466 = vst [vmem:[%s689_s25 + $0xe0] sm:$0xff] %v402_v25  ;;  %v295_v49 = vmul.f32 %v628_v0, %v1101_v24  ;;  %v420_v36 = vmax.f32 %v356_v1, 0.0  ;;  %v360_v5 = vadd.f32 %v638_v6, %v292_v34  ;;  %v1102_v25 = vld [vmem:[#allocation4_spill] sm:$0xff]  ;;  %v421_v14 = vmax.f32 %v357_v2, 0.0 }
  0x49   : > { %467 = vst [vmem:[%s689_s25 + $0xe8] sm:$0xff] %v403_v51  ;;  %v296_v50 = vmul.f32 %v628_v0, %v1102_v25  ;;  %v361_v37 = vadd.f32 %v638_v6, %v293_v47  ;;  %v1103_v51 = vld [vmem:[#allocation5_spill] sm:$0xff]  ;;  %v422_v29 = vmax.f32 %v358_v3, 0.0  ;;  %v298_v30 = vmul.f32 %v628_v0, %v1104_v38 }
  0x4a   : > { %468 = vst [vmem:[%s689_s25 + $0xf0] sm:$0xff] %v404_v52  ;;  %v297_v21 = vmul.f32 %v628_v0, %v1103_v51  ;;  %v362_v52 = vadd.f32 %v638_v6, %v294_v48  ;;  %v363_v26 = vadd.f32 %v638_v6, %v295_v49  ;;  %v424_v13 = vmax.f32 %v360_v5, 0.0 }
  0x4b   : > { %469 = vst [vmem:[%s689_s25 + $0xf8] sm:$0xff] %v405_v18  ;;  %v423_v18 = vmax.f32 %v359_v4, 0.0  ;;  %v364_v15 = vadd.f32 %v638_v6, %v296_v50  ;;  %v425_v40 = vmax.f32 %v361_v37, 0.0  ;;  %v302_v57 = vmul.f32 %v628_v0, %v833_v7 }
  0x4c   : > { %470 = vst [vmem:[%s689_s25 + $0x100] sm:$0xff] %v406_v54  ;;  %v299_v54 = vmul.f32 %v628_v0, %v1105_v39  ;;  %v365_v27 = vadd.f32 %v638_v6, %v297_v21  ;;  %v426_v41 = vmax.f32 %v362_v52, 0.0  ;;  %v427_v31 = vmax.f32 %v363_v26, 0.0 }
  0x4d   : > { %471 = vst [vmem:[%s689_s25 + $0x108] sm:$0xff] %v407_v55  ;;  %v300_v55 = vmul.f32 %v628_v0, %v827_v28  ;;  %v428_v8 = vmax.f32 %v364_v15, 0.0  ;;  %v304_v43 = vmul.f32 %v628_v0, %v1108_v59  ;;  %v370_v16 = vadd.f32 %v638_v6, %v302_v57 }
  0x4e   : > { %472 = vst [vmem:[%s689_s25 + $0x110] sm:$0xff] %v408_v10  ;;  %v1106_v10 = vld [vmem:[#allocation8_spill] sm:$0xff]  ;;  %v367_v28 = vadd.f32 %v638_v6, %v299_v54  ;;  %v429_v7 = vmax.f32 %v365_v27, 0.0  ;;  %v437_v63 = vmax.f32 %v967_v53, 0.0 }
  0x4f   : > { %473 = vst [vmem:[%s689_s25 + $0x118] sm:$0xff] %v409_v11  ;;  %v301_v56 = vmul.f32 %v628_v0, %v1106_v10  ;;  %v366_v11 = vadd.f32 %v638_v6, %v298_v30  ;;  %v372_v9 = vadd.f32 %v638_v6, %v304_v43  ;;  %v434_v62 = vmax.f32 %v370_v16, 0.0 }
  0x50   : > { %474 = vst [vmem:[%s689_s25 + $0x120] sm:$0xff] %v410_v42  ;;  %v1107_v42 = vld [vmem:[#allocation9_spill] sm:$0xff] }
  0x51   : > { %475 = vst [vmem:[%s689_s25 + $0x128] sm:$0xff] %v411_v12  ;;  %v303_v58 = vmul.f32 %v628_v0, %v1107_v42  ;;  %v368_v12 = vadd.f32 %v638_v6, %v300_v55  ;;  %v430_v60 = vmax.f32 %v366_v11, 0.0 }
  0x52   : > { %476 = vst [vmem:[%s689_s25 + $0x130] sm:$0xff] %v412_v32  ;;  %v369_v32 = vadd.f32 %v638_v6, %v301_v56 }
  0x53   : > { %477 = vst [vmem:[%s689_s25 + $0x138] sm:$0xff] %v413_v44  ;;  %v431_v44 = vmax.f32 %v367_v28, 0.0  ;;  %v371_v61 = vadd.f32 %v638_v6, %v303_v58  ;;  %v432_v0 = vmax.f32 %v368_v12, 0.0 }
  0x54   : > { %478 = vst [vmem:[%s689_s25 + $0x140] sm:$0xff] %v414_v33  ;;  %v433_v33 = vmax.f32 %v369_v32, 0.0 }
  0x55   : > { %479 = vst [vmem:[%s689_s25 + $0x148] sm:$0xff] %v415_v17  ;;  %v435_v45 = vmax.f32 %v371_v61, 0.0  ;;  %v436_v17 = vmax.f32 %v372_v9, 0.0 }
  0x56   : > { %480 = vst [vmem:[%s689_s25 + $0x150] sm:$0xff] %v416_v46 }
  0x57   : > { %481 = vst [vmem:[%s689_s25 + $0x158] sm:$0xff] %v417_v20 }
  0x58   : > { %482 = vst [vmem:[%s689_s25 + $0x160] sm:$0xff] %v418_v22 }
  0x59   : > { %483 = vst [vmem:[%s689_s25 + $0x168] sm:$0xff] %v419_v23 }
  0x5a   : > { %484 = vst [vmem:[%s689_s25 + $0x170] sm:$0xff] %v420_v36 }
  0x5b   : > { %485 = vst [vmem:[%s689_s25 + $0x178] sm:$0xff] %v421_v14 }
  0x5c   : > { %486 = vst [vmem:[%s689_s25 + $0x180] sm:$0xff] %v422_v29 }
  0x5d   : > { %487 = vst [vmem:[%s689_s25 + $0x188] sm:$0xff] %v423_v18 }
  0x5e   : > { %488 = vst [vmem:[%s689_s25 + $0x190] sm:$0xff] %v424_v13 }
  0x5f   : > { %489 = vst [vmem:[%s689_s25 + $0x198] sm:$0xff] %v425_v40 }
  0x60   : > { %490 = vst [vmem:[%s689_s25 + $0x1a0] sm:$0xff] %v426_v41 }
  0x61   : > { %491 = vst [vmem:[%s689_s25 + $0x1a8] sm:$0xff] %v427_v31 }
  0x62   : > { %492 = vst [vmem:[%s689_s25 + $0x1b0] sm:$0xff] %v428_v8 }
  0x63   : > { %493 = vst [vmem:[%s689_s25 + $0x1b8] sm:$0xff] %v429_v7 }
  0x64   : > { %494 = vst [vmem:[%s689_s25 + $0x1c0] sm:$0xff] %v430_v60 }
  0x65   : > { %495 = vst [vmem:[%s689_s25 + $0x1c8] sm:$0xff] %v431_v44 }
  0x66   : > { %496 = vst [vmem:[%s689_s25 + $0x1d0] sm:$0xff] %v432_v0 }
  0x67   : > { %497 = vst [vmem:[%s689_s25 + $0x1d8] sm:$0xff] %v433_v33 }
  0x68   : > { %498 = vst [vmem:[%s689_s25 + $0x1e0] sm:$0xff] %v434_v62 }
  0x69   : > { %499 = vst [vmem:[%s689_s25 + $0x1e8] sm:$0xff] %v435_v45 }
  0x6a   : > { %500 = vst [vmem:[%s689_s25 + $0x1f0] sm:$0xff] %v436_v17 }
  0x6b   : > { %501 = vst [vmem:[%s689_s25 + $0x1f8] sm:$0xff] %v437_v63 }
  0x6c PF: > { %s13_s12 = sadd.s32 1, %s585_s12  }
  0x6d   : > { %p10_p4 = scmp.ge.s32.totalorder %s13_s12, 6  }
  0x6f   :  { %12 = sbr.rel (!%p10_p4) target bundleno = 1 (0x1), region = 62 }

// kernel: backbone_block_forward.2
= control target key start
LH: loop header
LB: loop body
LE: loop exit
PB: predicated region body
PF: predicated region fallthrough
CT: control target
= control target key end

     0   :  { %s1494_s15 = smov 0   ;;  %s1496_s16 = smov 0   ;;  %s2070_s0 = inlined_call_operand.vmem [shape: bf16[2048,128], index: 0, kind: input, shape index: {}]   ;;  %s2071_s1 = inlined_call_operand.vmem [shape: bf16[128,128], index: 1, kind: input, shape index: {}]   ;;  %s2072_s2 = inlined_call_operand.vmem [shape: f32[2048,128], index: 2, kind: output, shape index: {0}]   ;;  %s2073_s3 = inlined_call_operand.vmem [shape: f32[2,1,128], index: 3, kind: output, shape index: {1}]   ;;  %s2074_s4 = inlined_call_operand.vmem [shape: f32[2,1,128], index: 4, kind: output, shape index: {2}]  }
   0x1   :  { %s1498_s17 = smov 0   ;;  %s1500_s18 = smov 0  }
   0x2   :  { %s1502_s19 = smov 0  }
   0x3 LB: > { %s24_s20 = sadd.s32 1, %s1458_s17  ;;  %s27_s21 = sadd.s32 1, %s1462_s18  ;;  %s1466_s19 = sphi %s1502_s19, %s15_s19   ;;  %s1462_s18 = sphi %s1500_s18, %s2126_s18   ;;  %s1458_s17 = sphi %s1498_s17, %s2125_s17   ;;  %s1454_s16 = sphi %s1496_s16, %s2124_s16   ;;  %s1450_s15 = sphi %s1494_s15, %s2123_s15  }
   0x4   : > { %p25_p0 = scmp.ge.s32.totalorder %s24_s20, 2  ;;  %p1153_p1 = scmp.ge.s32.totalorder %s1466_s19, 1 }
   0x5   : > { %p192_p2 = scmp.lt.s32.totalorder %s1466_s19, 5 }
   0x6   : > { %s2128_s20 = smov (%p25_p0, %s24_s20), 0  ;;  %s2130_s21 = smov (!%p25_p0, %s27_s21), %s1462_s18 }
   0x7   : > { %p193_p3 = pnand %p1153_p1, %p192_p2  ;;  %p29_p4 = scmp.ge.s32.totalorder %s2130_s21, 2 }
   0x9   : > { %s2132_s21 = smov (%p29_p4, %s2130_s21), 0  ;;  %196 = sbr.rel (%p193_p3) target bundleno = 448 (0x1c0), region = 28 }
   0xe   : > { %p248_p5 = scmp.lt.s32.totalorder %s1454_s16, 1  ;;  %v1362_v0 = vld [vmem:[%s2071_s1 + $0x38] sm:$0xff]  ;;  %v1361_v1 = vld [vmem:[%s2071_s1 + $0x30] sm:$0xff]  ;;  %v1360_v2 = vld [vmem:[%s2071_s1 + $0x28] sm:$0xff]  ;;  %s1154_s9 = sshll.u32 %s1454_s16, 1 }
   0xf   : > { %574 = vmatpush.bf16.msra.mxu0 %v1362_v0  ;;  %1363 = vmatpush.bf16.msra.mxu1 %v1362_v0  ;;  %s229_s10 = sadd.s32 %s1450_s15, %s1154_s9  ;;  %v1359_v3 = vld [vmem:[%s2071_s1 + $0x20] sm:$0xff]  ;;  %v1358_v4 = vld [vmem:[%s2071_s1 + $0x18] sm:$0xff]  ;;  %v1357_v5 = vld [vmem:[%s2071_s1 + $0x10] sm:$0xff]  ;;  %p1320_p7 = scmp.ne.s32.totalorder %s1450_s15, 0 }
  0x10   : > { %s249_s24 = scalar_select %p248_p5, %s1454_s16, 1  ;;  %1364 = vmatpush.bf16.msra.mxu2 %v1362_v0  ;;  %1365 = vmatpush.bf16.msra.mxu3 %v1362_v0  ;;  %v1356_v6 = vld [vmem:[%s2071_s1 + $0x8] sm:$0xff]  ;;  %v1355_v7 = vld [vmem:[%s2071_s1] sm:$0xff] }
  0x11   : > { %s1155_s13 = sshll.u32 %s229_s10, 6 }
  0x12   : > { %s1539_s29 = scalar_lea.vmem %s2073_s3, %s249_s24  ;;  %s1544_s6 = scalar_lea.vmem %s2074_s4, %s249_s24 }
  0x13   : > { %575 = vmatpush.bf16.msra.mxu0 %v1361_v1  ;;  %1366 = vmatpush.bf16.msra.mxu1 %v1361_v1  ;;  %p231_p6 = scmp.lt.s32.totalorder %s1155_s13, 255 }
  0x14   : > { %1367 = vmatpush.bf16.msra.mxu2 %v1361_v1  ;;  %1368 = vmatpush.bf16.msra.mxu3 %v1361_v1 }
  0x15   : > { %s2134_s13 = smov (!%p231_p6, %s1155_s13), 255 }
  0x16   : > { %s1156_s26 = sshll.u32 %s2134_s13, 2  ;;  %s1159_s8 = sshll.u32 %s2134_s13, 3 }
  0x17   : > { %576 = vmatpush.bf16.msra.mxu0 %v1360_v2  ;;  %1369 = vmatpush.bf16.msra.mxu1 %v1360_v2  ;;  %s1572_s7 = scalar_lea.vmem %s2070_s0, %s1156_s26  ;;  %s1610_s11 = scalar_lea.vmem %s2072_s2, %s1159_s8 }
  0x18   : > { %1370 = vmatpush.bf16.msra.mxu2 %v1360_v2  ;;  %1371 = vmatpush.bf16.msra.mxu3 %v1360_v2  ;;  %v1323_v8 = vld [vmem:[%s1572_s7] sm:$0xff]  ;;  %v1324_v12 = vld [vmem:[%s1572_s7 + $0x8] sm:$0xff]  ;;  %v1325_v16 = vld [vmem:[%s1572_s7 + $0x10] sm:$0xff] }
  0x19   : > { %v1331_v9 = vld [vmem:[%s1572_s7 + $0x40] sm:$0xff]  ;;  %v1332_v13 = vld [vmem:[%s1572_s7 + $0x48] sm:$0xff]  ;;  %v1333_v17 = vld [vmem:[%s1572_s7 + $0x50] sm:$0xff] }
  0x1a   : > { %v1339_v10 = vld [vmem:[%s1572_s7 + $0x80] sm:$0xff]  ;;  %v1340_v14 = vld [vmem:[%s1572_s7 + $0x88] sm:$0xff]  ;;  %v1341_v18 = vld [vmem:[%s1572_s7 + $0x90] sm:$0xff] }
  0x1b   : > { %577 = vmatpush.bf16.msra.mxu0 %v1359_v3  ;;  %1372 = vmatpush.bf16.msra.mxu1 %v1359_v3  ;;  %v1347_v11 = vld [vmem:[%s1572_s7 + $0xc0] sm:$0xff]  ;;  %v1348_v15 = vld [vmem:[%s1572_s7 + $0xc8] sm:$0xff]  ;;  %v1349_v19 = vld [vmem:[%s1572_s7 + $0xd0] sm:$0xff] }
  0x1c   : > { %1373 = vmatpush.bf16.msra.mxu2 %v1359_v3  ;;  %1374 = vmatpush.bf16.msra.mxu3 %v1359_v3  ;;  %v1326_v20 = vld [vmem:[%s1572_s7 + $0x18] sm:$0xff]  ;;  %v1327_v24 = vld [vmem:[%s1572_s7 + $0x20] sm:$0xff]  ;;  %v1328_v28 = vld [vmem:[%s1572_s7 + $0x28] sm:$0xff] }
  0x1d   : > { %v1334_v21 = vld [vmem:[%s1572_s7 + $0x58] sm:$0xff]  ;;  %v1335_v25 = vld [vmem:[%s1572_s7 + $0x60] sm:$0xff]  ;;  %v1336_v29 = vld [vmem:[%s1572_s7 + $0x68] sm:$0xff] }
  0x1e   : > { %v1342_v22 = vld [vmem:[%s1572_s7 + $0x98] sm:$0xff]  ;;  %v1343_v26 = vld [vmem:[%s1572_s7 + $0xa0] sm:$0xff]  ;;  %v1344_v30 = vld [vmem:[%s1572_s7 + $0xa8] sm:$0xff] }
  0x1f   : > { %578 = vmatpush.bf16.msra.mxu0 %v1358_v4  ;;  %1375 = vmatpush.bf16.msra.mxu1 %v1358_v4  ;;  %v1350_v23 = vld [vmem:[%s1572_s7 + $0xd8] sm:$0xff]  ;;  %v1351_v27 = vld [vmem:[%s1572_s7 + $0xe0] sm:$0xff]  ;;  %v1352_v31 = vld [vmem:[%s1572_s7 + $0xe8] sm:$0xff] }
  0x20   : > { %1376 = vmatpush.bf16.msra.mxu2 %v1358_v4  ;;  %1377 = vmatpush.bf16.msra.mxu3 %v1358_v4  ;;  %v1329_v32 = vld [vmem:[%s1572_s7 + $0x30] sm:$0xff]  ;;  %v1330_v36 = vld [vmem:[%s1572_s7 + $0x38] sm:$0xff] }
  0x21   : > { %v1337_v33 = vld [vmem:[%s1572_s7 + $0x70] sm:$0xff]  ;;  %v1338_v37 = vld [vmem:[%s1572_s7 + $0x78] sm:$0xff] }
  0x22   : > { %v1345_v34 = vld [vmem:[%s1572_s7 + $0xb0] sm:$0xff]  ;;  %v1346_v38 = vld [vmem:[%s1572_s7 + $0xb8] sm:$0xff] }
  0x23   : > { %579 = vmatpush.bf16.msra.mxu0 %v1357_v5  ;;  %1378 = vmatpush.bf16.msra.mxu1 %v1357_v5  ;;  %v1353_v35 = vld [vmem:[%s1572_s7 + $0xf0] sm:$0xff]  ;;  %v1354_v39 = vld [vmem:[%s1572_s7 + $0xf8] sm:$0xff] }
  0x24   : > { %1379 = vmatpush.bf16.msra.mxu2 %v1357_v5  ;;  %1380 = vmatpush.bf16.msra.mxu3 %v1357_v5 }
  0x27   : > { %580 = vmatpush.bf16.msra.mxu0 %v1356_v6  ;;  %1381 = vmatpush.bf16.msra.mxu1 %v1356_v6 }
  0x28   : > { %1382 = vmatpush.bf16.msra.mxu2 %v1356_v6  ;;  %1383 = vmatpush.bf16.msra.mxu3 %v1356_v6 }
  0x2b   : > { %581 = vmatpush.bf16.msra.mxu0 %v1355_v7  ;;  %1384 = vmatpush.bf16.msra.mxu1 %v1355_v7 }
  0x2c   : > { %1385 = vmatpush.bf16.msra.mxu2 %v1355_v7  ;;  %1386 = vmatpush.bf16.msra.mxu3 %v1355_v7 }
  0x2e   : > { %582 = vmatmul.bf16.vlgmr.msra.gmra.mxu0 %v1323_v8  ;;  %622 = vmatmul.bf16.vlgmr.msra.gmra.mxu1 %v1331_v9 }
  0x2f   : > { %662 = vmatmul.bf16.vlgmr.msra.gmra.mxu2 %v1339_v10  ;;  %702 = vmatmul.bf16.vlgmr.msra.gmra.mxu3 %v1347_v11 }
  0x3e   : > { %587 = vmatmul.bf16.gmra.mxu0 %v1324_v12  ;;  %627 = vmatmul.bf16.gmra.mxu1 %v1332_v13 }
  0x3f   : > { %667 = vmatmul.bf16.gmra.mxu2 %v1340_v14  ;;  %707 = vmatmul.bf16.gmra.mxu3 %v1348_v15 }
  0x4e   : > { %592 = vmatmul.bf16.gmra.mxu0 %v1325_v16  ;;  %632 = vmatmul.bf16.gmra.mxu1 %v1333_v17 }
  0x4f   : > { %672 = vmatmul.bf16.gmra.mxu2 %v1341_v18  ;;  %712 = vmatmul.bf16.gmra.mxu3 %v1349_v19 }
  0x5e   : > { %597 = vmatmul.bf16.gmra.mxu0 %v1326_v20  ;;  %637 = vmatmul.bf16.gmra.mxu1 %v1334_v21 }
  0x5f   : > { %677 = vmatmul.bf16.gmra.mxu2 %v1342_v22  ;;  %717 = vmatmul.bf16.gmra.mxu3 %v1350_v23 }
  0x6e   : > { %602 = vmatmul.bf16.gmra.mxu0 %v1327_v24  ;;  %642 = vmatmul.bf16.gmra.mxu1 %v1335_v25 }
  0x6f   : > { %682 = vmatmul.bf16.gmra.mxu2 %v1343_v26  ;;  %722 = vmatmul.bf16.gmra.mxu3 %v1351_v27 }
  0x7e   : > { %607 = vmatmul.bf16.gmra.mxu0 %v1328_v28  ;;  %647 = vmatmul.bf16.gmra.mxu1 %v1336_v29 }
  0x7f   : > { %687 = vmatmul.bf16.gmra.mxu2 %v1344_v30  ;;  %727 = vmatmul.bf16.gmra.mxu3 %v1352_v31 }
  0x8e   : > { %612 = vmatmul.bf16.gmra.mxu0 %v1329_v32  ;;  %652 = vmatmul.bf16.gmra.mxu1 %v1337_v33 }
  0x8f   : > { %692 = vmatmul.bf16.gmra.mxu2 %v1345_v34  ;;  %732 = vmatmul.bf16.gmra.mxu3 %v1353_v35 }
  0x9e   : > { %617 = vmatmul.bf16.gmra.mxu0 %v1330_v36  ;;  %657 = vmatmul.bf16.gmra.mxu1 %v1338_v37 }
  0x9f   : > { %697 = vmatmul.bf16.gmra.mxu2 %v1346_v38  ;;  %737 = vmatmul.bf16.gmra.mxu3 %v1354_v39 }
  0xab   : > { %v1612_v40 = vpop.f32.mrf.mxu0  ;;  %v1614_v41 = vpop.f32.mrf.mxu1 }
  0xac   : > { %743 = vst [vmem:[%s1610_s11] sm:$0xff] %v1612_v40 }
  0xad   : > { %759 = vst [vmem:[%s1610_s11 + $0x80] sm:$0xff] %v1614_v41 }
  0xb2   : > { %v1620_v42 = vpop.f32.mrf.mxu2  ;;  %v1622_v43 = vpop.f32.mrf.mxu3 }
  0xb3   : > { %775 = vst [vmem:[%s1610_s11 + $0x100] sm:$0xff] %v1620_v42  ;;  %v1626_v44 = vpop.f32.mrf.mxu0  ;;  %v1628_v45 = vpop.f32.mrf.mxu1 }
  0xb4   : > { %791 = vst [vmem:[%s1610_s11 + $0x180] sm:$0xff] %v1622_v43 }
  0xb5   : > { %744 = vst [vmem:[%s1610_s11 + $0x8] sm:$0xff] %v1626_v44 }
  0xb6   : > { %760 = vst [vmem:[%s1610_s11 + $0x88] sm:$0xff] %v1628_v45 }
  0xba   : > { %v1636_v46 = vpop.f32.mrf.mxu2  ;;  %v1638_v47 = vpop.f32.mrf.mxu3 }
  0xbb   : > { %776 = vst [vmem:[%s1610_s11 + $0x108] sm:$0xff] %v1636_v46  ;;  %v1642_v48 = vpop.f32.mrf.mxu0  ;;  %v1644_v49 = vpop.f32.mrf.mxu1 }
  0xbc   : > { %792 = vst [vmem:[%s1610_s11 + $0x188] sm:$0xff] %v1638_v47 }
  0xbd   : > { %745 = vst [vmem:[%s1610_s11 + $0x10] sm:$0xff] %v1642_v48 }
  0xbe   : > { %761 = vst [vmem:[%s1610_s11 + $0x90] sm:$0xff] %v1644_v49 }
  0xc2   : > { %v1652_v50 = vpop.f32.mrf.mxu2  ;;  %v1654_v51 = vpop.f32.mrf.mxu3 }
  0xc3   : > { %777 = vst [vmem:[%s1610_s11 + $0x110] sm:$0xff] %v1652_v50  ;;  %v1658_v52 = vpop.f32.mrf.mxu0  ;;  %v1660_v53 = vpop.f32.mrf.mxu1 }
  0xc4   : > { %793 = vst [vmem:[%s1610_s11 + $0x190] sm:$0xff] %v1654_v51 }
  0xc5   : > { %746 = vst [vmem:[%s1610_s11 + $0x18] sm:$0xff] %v1658_v52 }
  0xc6   : > { %762 = vst [vmem:[%s1610_s11 + $0x98] sm:$0xff] %v1660_v53 }
  0xca   : > { %v1668_v54 = vpop.f32.mrf.mxu2  ;;  %v1670_v55 = vpop.f32.mrf.mxu3 }
  0xcb   : > { %778 = vst [vmem:[%s1610_s11 + $0x118] sm:$0xff] %v1668_v54  ;;  %v1674_v56 = vpop.f32.mrf.mxu0  ;;  %v1676_v57 = vpop.f32.mrf.mxu1 }
  0xcc   : > { %794 = vst [vmem:[%s1610_s11 + $0x198] sm:$0xff] %v1670_v55 }
  0xcd   : > { %747 = vst [vmem:[%s1610_s11 + $0x20] sm:$0xff] %v1674_v56 }
  0xce   : > { %763 = vst [vmem:[%s1610_s11 + $0xa0] sm:$0xff] %v1676_v57 }
  0xd2   : > { %v1684_v58 = vpop.f32.mrf.mxu2  ;;  %v1686_v59 = vpop.f32.mrf.mxu3 }
  0xd3   : > { %2099 = vst [vmem:[#allocation2_spill] sm:$0xff] %v1686_v59  ;;  %v1690_v60 = vpop.f32.mrf.mxu0  ;;  %v1692_v61 = vpop.f32.mrf.mxu1 }
  0xd4   : > { %779 = vst [vmem:[%s1610_s11 + $0x120] sm:$0xff] %v1684_v58 }
  0xd5   : > { %795 = vst [vmem:[%s1610_s11 + $0x1a0] sm:$0xff] %v1686_v59 }
  0xd6   : > { %748 = vst [vmem:[%s1610_s11 + $0x28] sm:$0xff] %v1690_v60 }
  0xd7   : > { %764 = vst [vmem:[%s1610_s11 + $0xa8] sm:$0xff] %v1692_v61 }
  0xda   : > { %v1700_v62 = vpop.f32.mrf.mxu2  ;;  %v1702_v63 = vpop.f32.mrf.mxu3 }
  0xdb   : > { %2100 = vst [vmem:[#allocation3_spill] sm:$0xff] %v1702_v63  ;;  %v1706_v0 = vpop.f32.mrf.mxu0  ;;  %v1708_v1 = vpop.f32.mrf.mxu1 }
  0xdc   : > { %780 = vst [vmem:[%s1610_s11 + $0x128] sm:$0xff] %v1700_v62 }
  0xdd   : > { %796 = vst [vmem:[%s1610_s11 + $0x1a8] sm:$0xff] %v1702_v63 }
  0xde   : > { %749 = vst [vmem:[%s1610_s11 + $0x30] sm:$0xff] %v1706_v0 }
  0xdf   : > { %765 = vst [vmem:[%s1610_s11 + $0xb0] sm:$0xff] %v1708_v1 }
  0xe2   : > { %v1716_v2 = vpop.f32.mrf.mxu2  ;;  %v1718_v3 = vpop.f32.mrf.mxu3 }
  0xe3   : > { %2101 = vst [vmem:[#allocation4_spill] sm:$0xff] %v1718_v3  ;;  %v1722_v4 = vpop.f32.mrf.mxu0  ;;  %v1724_v5 = vpop.f32.mrf.mxu1 }
  0xe4   : > { %781 = vst [vmem:[%s1610_s11 + $0x130] sm:$0xff] %v1716_v2 }
  0xe5   : > { %797 = vst [vmem:[%s1610_s11 + $0x1b0] sm:$0xff] %v1718_v3 }
  0xe6   : > { %750 = vst [vmem:[%s1610_s11 + $0x38] sm:$0xff] %v1722_v4 }
  0xe7   : > { %766 = vst [vmem:[%s1610_s11 + $0xb8] sm:$0xff] %v1724_v5 }
  0xea   : > { %v1732_v6 = vpop.f32.mrf.mxu2  ;;  %v1734_v7 = vpop.f32.mrf.mxu3 }
  0xeb   : > { %2102 = vst [vmem:[#allocation5_spill] sm:$0xff] %v1734_v7  ;;  %v1738_v8 = vpop.f32.mrf.mxu0  ;;  %v1740_v9 = vpop.f32.mrf.mxu1 }
  0xec   : > { %782 = vst [vmem:[%s1610_s11 + $0x138] sm:$0xff] %v1732_v6 }
  0xed   : > { %798 = vst [vmem:[%s1610_s11 + $0x1b8] sm:$0xff] %v1734_v7 }
  0xee   : > { %751 = vst [vmem:[%s1610_s11 + $0x40] sm:$0xff] %v1738_v8 }
  0xef   : > { %767 = vst [vmem:[%s1610_s11 + $0xc0] sm:$0xff] %v1740_v9 }
  0xf2   : > { %v1748_v10 = vpop.f32.mrf.mxu2  ;;  %v1750_v11 = vpop.f32.mrf.mxu3 }
  0xf3   : > { %2103 = vst [vmem:[#allocation6_spill] sm:$0xff] %v1750_v11  ;;  %v1754_v12 = vpop.f32.mrf.mxu0  ;;  %v1756_v13 = vpop.f32.mrf.mxu1 }
  0xf4   : > { %783 = vst [vmem:[%s1610_s11 + $0x140] sm:$0xff] %v1748_v10 }
  0xf5   : > { %799 = vst [vmem:[%s1610_s11 + $0x1c0] sm:$0xff] %v1750_v11 }
  0xf6   : > { %752 = vst [vmem:[%s1610_s11 + $0x48] sm:$0xff] %v1754_v12 }
  0xf7   : > { %768 = vst [vmem:[%s1610_s11 + $0xc8] sm:$0xff] %v1756_v13 }
  0xfa   : > { %v1764_v14 = vpop.f32.mrf.mxu2  ;;  %v1766_v15 = vpop.f32.mrf.mxu3 }
  0xfb   : > { %2104 = vst [vmem:[#allocation7_spill] sm:$0xff] %v1766_v15  ;;  %v1770_v16 = vpop.f32.mrf.mxu0  ;;  %v1772_v17 = vpop.f32.mrf.mxu1 }
  0xfc   : > { %784 = vst [vmem:[%s1610_s11 + $0x148] sm:$0xff] %v1764_v14 }
  0xfd   : > { %800 = vst [vmem:[%s1610_s11 + $0x1c8] sm:$0xff] %v1766_v15 }
  0xfe   : > { %753 = vst [vmem:[%s1610_s11 + $0x50] sm:$0xff] %v1770_v16 }
  0xff   : > { %769 = vst [vmem:[%s1610_s11 + $0xd0] sm:$0xff] %v1772_v17 }
 0x102   : > { %v1780_v18 = vpop.f32.mrf.mxu2  ;;  %v1782_v19 = vpop.f32.mrf.mxu3 }
 0x103   : > { %2105 = vst [vmem:[#allocation8_spill] sm:$0xff] %v1782_v19  ;;  %v1786_v20 = vpop.f32.mrf.mxu0  ;;  %v1788_v21 = vpop.f32.mrf.mxu1 }
 0x104   : > { %785 = vst [vmem:[%s1610_s11 + $0x150] sm:$0xff] %v1780_v18 }
 0x105   : > { %801 = vst [vmem:[%s1610_s11 + $0x1d0] sm:$0xff] %v1782_v19 }
 0x106   : > { %754 = vst [vmem:[%s1610_s11 + $0x58] sm:$0xff] %v1786_v20 }
 0x107   : > { %770 = vst [vmem:[%s1610_s11 + $0xd8] sm:$0xff] %v1788_v21 }
 0x10a   : > { %v1796_v22 = vpop.f32.mrf.mxu2  ;;  %v1798_v23 = vpop.f32.mrf.mxu3 }
 0x10b   : > { %2106 = vst [vmem:[#allocation9_spill] sm:$0xff] %v1798_v23  ;;  %v1802_v24 = vpop.f32.mrf.mxu0  ;;  %v1804_v25 = vpop.f32.mrf.mxu1 }
 0x10c   : > { %786 = vst [vmem:[%s1610_s11 + $0x158] sm:$0xff] %v1796_v22 }
 0x10d   : > { %802 = vst [vmem:[%s1610_s11 + $0x1d8] sm:$0xff] %v1798_v23 }
 0x10e   : > { %755 = vst [vmem:[%s1610_s11 + $0x60] sm:$0xff] %v1802_v24 }
 0x10f   : > { %771 = vst [vmem:[%s1610_s11 + $0xe0] sm:$0xff] %v1804_v25 }
 0x112   : > { %v1812_v26 = vpop.f32.mrf.mxu2  ;;  %v1814_v27 = vpop.f32.mrf.mxu3 }
 0x113   : > { %2107 = vst [vmem:[#allocation10_spill] sm:$0xff] %v1814_v27  ;;  %v1818_v28 = vpop.f32.mrf.mxu0  ;;  %v1820_v29 = vpop.f32.mrf.mxu1 }
 0x114   : > { %787 = vst [vmem:[%s1610_s11 + $0x160] sm:$0xff] %v1812_v26 }
 0x115   : > { %803 = vst [vmem:[%s1610_s11 + $0x1e0] sm:$0xff] %v1814_v27 }
 0x116   : > { %756 = vst [vmem:[%s1610_s11 + $0x68] sm:$0xff] %v1818_v28 }
 0x117   : > { %772 = vst [vmem:[%s1610_s11 + $0xe8] sm:$0xff] %v1820_v29 }
 0x11a   : > { %v1828_v30 = vpop.f32.mrf.mxu2  ;;  %v1830_v31 = vpop.f32.mrf.mxu3 }
 0x11b   : > { %2108 = vst [vmem:[#allocation11_spill] sm:$0xff] %v1830_v31  ;;  %v618_v32 = vpop.f32.mrf.mxu0  ;;  %v1834_v33 = vpop.f32.mrf.mxu1 }
 0x11c   : > { %788 = vst [vmem:[%s1610_s11 + $0x168] sm:$0xff] %v1828_v30 }
 0x11d   : > { %804 = vst [vmem:[%s1610_s11 + $0x1e8] sm:$0xff] %v1830_v31 }
 0x11e   : > { %757 = vst [vmem:[%s1610_s11 + $0x70] sm:$0xff] %v618_v32 }
 0x11f   : > { %773 = vst [vmem:[%s1610_s11 + $0xf0] sm:$0xff] %v1834_v33 }
 0x122   : > { %v1841_v34 = vpop.f32.mrf.mxu2  ;;  %v1843_v35 = vpop.f32.mrf.mxu3 }
 0x123   : > { %2109 = vst [vmem:[#allocation12_spill] sm:$0xff] %v1843_v35  ;;  %v620_v36 = vpop.f32.mrf.mxu0  ;;  %v1847_v37 = vpop.f32.mrf.mxu1 }
 0x124   : > { %789 = vst [vmem:[%s1610_s11 + $0x170] sm:$0xff] %v1841_v34 }
 0x125   : > { %805 = vst [vmem:[%s1610_s11 + $0x1f0] sm:$0xff] %v1843_v35 }
 0x126   : > { %758 = vst [vmem:[%s1610_s11 + $0x78] sm:$0xff] %v620_v36 }
 0x127   : > { %774 = vst [vmem:[%s1610_s11 + $0xf8] sm:$0xff] %v1847_v37 }
 0x129   : > { %810 = sbr.rel (%p1320_p7) target bundleno = 305 (0x131), region = 32 }
 0x12a   : > { %v1854_v38 = vpop.f32.mrf.mxu2  ;;  %v1856_v39 = vpop.f32.mrf.mxu3 }
 0x12b   : > { %2110 = vst [vmem:[#allocation13_spill] sm:$0xff] %v1856_v39 }
 0x12c   : > { %790 = vst [vmem:[%s1610_s11 + $0x178] sm:$0xff] %v1854_v38 }
 0x12d   : > { %806 = vst [vmem:[%s1610_s11 + $0x1f8] sm:$0xff] %v1856_v39 }
 0x12e   : > { %v1468_v31 = vmov 0.0  }
 0x12f   : > { %811 = vst [vmem:[%s1539_s29] sm:$0x1] %v1468_v31 }
 0x130   : > { %812 = vst [vmem:[%s1544_s6] sm:$0x1] %v1468_v31 }
 0x131 PF: > { %v814_v35 = vadd.f32 %v1626_v44, %v1612_v40  ;;  %v886_v27 = vmul.f32 %v1612_v40, %v1612_v40  ;;  %v887_v23 = vmul.f32 %v1626_v44, %v1626_v44  ;;  %v888_v19 = vmul.f32 %v1642_v48, %v1642_v48 }
 0x132   : > { %v889_v31 = vmul.f32 %v1658_v52, %v1658_v52  ;;  %v890_v3 = vmul.f32 %v1674_v56, %v1674_v56  ;;  %v891_v44 = vmul.f32 %v1690_v60, %v1690_v60 }
 0x133   : > { %v815_v39 = vadd.f32 %v814_v35, %v1642_v48  ;;  %v950_v11 = vadd.f32 %v887_v23, %v886_v27 }
 0x135   : > { %v816_v15 = vadd.f32 %v815_v39, %v1658_v52  ;;  %v951_v40 = vadd.f32 %v950_v11, %v888_v19  ;;  %v892_v39 = vmul.f32 %v1706_v0, %v1706_v0 }
 0x137   : > { %v817_v7 = vadd.f32 %v816_v15, %v1674_v56  ;;  %v952_v35 = vadd.f32 %v951_v40, %v889_v31  ;;  %v893_v15 = vmul.f32 %v1722_v4, %v1722_v4  ;;  %v898_v40 = vmul.f32 %v1802_v24, %v1802_v24 }
 0x139   : > { %v818_v63 = vadd.f32 %v817_v7, %v1690_v60  ;;  %v953_v59 = vadd.f32 %v952_v35, %v890_v3  ;;  %v894_v7 = vmul.f32 %v1738_v8, %v1738_v8  ;;  %v896_v3 = vmul.f32 %v1770_v16, %v1770_v16 }
 0x13a   : > { %v899_v35 = vmul.f32 %v1818_v28, %v1818_v28 }
 0x13b   : > { %v819_v48 = vadd.f32 %v818_v63, %v1706_v0  ;;  %v954_v23 = vadd.f32 %v953_v59, %v891_v44  ;;  %v895_v63 = vmul.f32 %v1754_v12, %v1754_v12 }
 0x13d   : > { %v820_v52 = vadd.f32 %v819_v48, %v1722_v4  ;;  %v955_v11 = vadd.f32 %v954_v23, %v892_v39  ;;  %v897_v4 = vmul.f32 %v1786_v20, %v1786_v20  ;;  %v900_v39 = vmul.f32 %v618_v32, %v618_v32 }
 0x13e   : > { %v901_v23 = vmul.f32 %v620_v36, %v620_v36 }
 0x13f   : > { %v821_v56 = vadd.f32 %v820_v52, %v1738_v8  ;;  %v956_v19 = vadd.f32 %v955_v11, %v893_v15 }
 0x141   : > { %v822_v60 = vadd.f32 %v821_v56, %v1754_v12  ;;  %v957_v27 = vadd.f32 %v956_v19, %v894_v7  ;;  %v902_v7 = vmul.f32 %v1614_v41, %v1614_v41 }
 0x143   : > { %v823_v0 = vadd.f32 %v822_v60, %v1770_v16  ;;  %v958_v31 = vadd.f32 %v957_v27, %v895_v63  ;;  %v903_v60 = vmul.f32 %v1628_v45, %v1628_v45  ;;  %v906_v27 = vmul.f32 %v1676_v57, %v1676_v57 }
 0x145   : > { %v824_v59 = vadd.f32 %v823_v0, %v1786_v20  ;;  %v959_v44 = vadd.f32 %v958_v31, %v896_v3  ;;  %v905_v0 = vmul.f32 %v1660_v53, %v1660_v53 }
 0x147   : > { %v825_v8 = vadd.f32 %v824_v59, %v1802_v24  ;;  %v960_v48 = vadd.f32 %v959_v44, %v897_v4  ;;  %v907_v4 = vmul.f32 %v1692_v61, %v1692_v61  ;;  %v909_v44 = vmul.f32 %v1724_v5, %v1724_v5 }
 0x149   : > { %v826_v12 = vadd.f32 %v825_v8, %v1818_v28  ;;  %v961_v52 = vadd.f32 %v960_v48, %v898_v40  ;;  %v908_v8 = vmul.f32 %v1708_v1, %v1708_v1 }
 0x14b   : > { %v827_v16 = vadd.f32 %v826_v12, %v618_v32  ;;  %v962_v56 = vadd.f32 %v961_v52, %v899_v35  ;;  %v904_v32 = vmul.f32 %v1644_v49, %v1644_v49  ;;  %v910_v35 = vmul.f32 %v1740_v9, %v1740_v9 }
 0x14c   : > { %v912_v52 = vmul.f32 %v1772_v17, %v1772_v17 }
 0x14d   : > { %v828_v15 = vadd.f32 %v827_v16, %v620_v36  ;;  %v963_v11 = vadd.f32 %v962_v56, %v900_v39  ;;  %v911_v16 = vmul.f32 %v1756_v13, %v1756_v13 }
 0x14f   : > { %v829_v20 = vadd.f32 %v828_v15, %v1614_v41  ;;  %v964_v63 = vadd.f32 %v963_v11, %v901_v23  ;;  %v913_v23 = vmul.f32 %v1788_v21, %v1788_v21  ;;  %v915_v11 = vmul.f32 %v1820_v29, %v1820_v29 }
 0x151   : > { %v830_v24 = vadd.f32 %v829_v20, %v1628_v45  ;;  %v965_v19 = vadd.f32 %v964_v63, %v902_v7  ;;  %v914_v20 = vmul.f32 %v1804_v25, %v1804_v25 }
 0x153   : > { %v831_v28 = vadd.f32 %v830_v24, %v1644_v49  ;;  %v966_v3 = vadd.f32 %v965_v19, %v903_v60  ;;  %v916_v60 = vmul.f32 %v1834_v33, %v1834_v33  ;;  %v918_v19 = vmul.f32 %v1620_v42, %v1620_v42 }
 0x155   : > { %v832_v36 = vadd.f32 %v831_v28, %v1660_v53  ;;  %v967_v59 = vadd.f32 %v966_v3, %v904_v32  ;;  %v917_v28 = vmul.f32 %v1847_v37, %v1847_v37 }
 0x157   : > { %v833_v41 = vadd.f32 %v832_v36, %v1676_v57  ;;  %v968_v31 = vadd.f32 %v967_v59, %v905_v0  ;;  %v919_v0 = vmul.f32 %v1636_v46, %v1636_v46  ;;  %v921_v59 = vmul.f32 %v1668_v54, %v1668_v54 }
 0x159   : > { %v834_v45 = vadd.f32 %v833_v41, %v1692_v61  ;;  %v969_v40 = vadd.f32 %v968_v31, %v906_v27  ;;  %v920_v41 = vmul.f32 %v1652_v50, %v1652_v50 }
 0x15b   : > { %v835_v49 = vadd.f32 %v834_v45, %v1708_v1  ;;  %v970_v12 = vadd.f32 %v969_v40, %v907_v4  ;;  %v922_v4 = vmul.f32 %v1684_v58, %v1684_v58  ;;  %v924_v40 = vmul.f32 %v1716_v2, %v1716_v2 }
 0x15d   : > { %v836_v53 = vadd.f32 %v835_v49, %v1724_v5  ;;  %v971_v48 = vadd.f32 %v970_v12, %v908_v8  ;;  %v923_v49 = vmul.f32 %v1700_v62, %v1700_v62 }
 0x15f   : > { %v837_v57 = vadd.f32 %v836_v53, %v1740_v9  ;;  %v972_v39 = vadd.f32 %v971_v48, %v909_v44  ;;  %v925_v44 = vmul.f32 %v1732_v6, %v1732_v6  ;;  %v927_v48 = vmul.f32 %v1764_v14, %v1764_v14 }
 0x161   : > { %v838_v61 = vadd.f32 %v837_v57, %v1756_v13  ;;  %v973_v15 = vadd.f32 %v972_v39, %v910_v35  ;;  %v926_v57 = vmul.f32 %v1748_v10, %v1748_v10 }
 0x163   : > { %v839_v1 = vadd.f32 %v838_v61, %v1772_v17  ;;  %v974_v56 = vadd.f32 %v973_v15, %v911_v16  ;;  %v928_v16 = vmul.f32 %v1780_v18, %v1780_v18  ;;  %v930_v15 = vmul.f32 %v1812_v26, %v1812_v26 }
 0x165   : > { %v840_v5 = vadd.f32 %v839_v1, %v1788_v21  ;;  %v975_v7 = vadd.f32 %v974_v56, %v912_v52  ;;  %v929_v1 = vmul.f32 %v1796_v22, %v1796_v22 }
 0x167   : > { %v841_v9 = vadd.f32 %v840_v5, %v1804_v25  ;;  %v976_v24 = vadd.f32 %v975_v7, %v913_v23  ;;  %v931_v23 = vmul.f32 %v1828_v30, %v1828_v30  ;;  %v933_v7 = vmul.f32 %v1854_v38, %v1854_v38 }
 0x169   : > { %v842_v13 = vadd.f32 %v841_v9, %v1820_v29  ;;  %v977_v63 = vadd.f32 %v976_v24, %v914_v20  ;;  %v932_v9 = vmul.f32 %v1841_v34, %v1841_v34 }
 0x16b   : > { %v843_v17 = vadd.f32 %v842_v13, %v1834_v33  ;;  %v978_v32 = vadd.f32 %v977_v63, %v915_v11  ;;  %v934_v11 = vmul.f32 %v1622_v43, %v1622_v43  ;;  %v936_v63 = vmul.f32 %v1654_v51, %v1654_v51 }
 0x16d   : > { %v844_v21 = vadd.f32 %v843_v17, %v1847_v37  ;;  %v979_v36 = vadd.f32 %v978_v32, %v916_v60  ;;  %v935_v17 = vmul.f32 %v1638_v47, %v1638_v47 }
 0x16f   : > { %v845_v25 = vadd.f32 %v844_v21, %v1620_v42  ;;  %v980_v3 = vadd.f32 %v979_v36, %v917_v28  ;;  %v937_v28 = vmul.f32 %v1670_v55, %v1670_v55 }
 0x171   : > { %v846_v29 = vadd.f32 %v845_v25, %v1636_v46  ;;  %v981_v27 = vadd.f32 %v980_v3, %v918_v19 }
 0x173   : > { %v847_v33 = vadd.f32 %v846_v29, %v1652_v50  ;;  %v982_v45 = vadd.f32 %v981_v27, %v919_v0 }
 0x175   : > { %v848_v37 = vadd.f32 %v847_v33, %v1668_v54  ;;  %v983_v31 = vadd.f32 %v982_v45, %v920_v41 }
 0x177   : > { %v849_v42 = vadd.f32 %v848_v37, %v1684_v58  ;;  %v984_v8 = vadd.f32 %v983_v31, %v921_v59 }
 0x179   : > { %v850_v46 = vadd.f32 %v849_v42, %v1700_v62  ;;  %v985_v53 = vadd.f32 %v984_v8, %v922_v4  ;;  %v2115_v42 = vld [vmem:[#allocation6_spill] sm:$0xff] }
 0x17a   : > { %v942_v31 = vmul.f32 %v2115_v42, %v2115_v42 }
 0x17b   : > { %v851_v50 = vadd.f32 %v850_v46, %v1716_v2  ;;  %v986_v12 = vadd.f32 %v985_v53, %v923_v49  ;;  %v2116_v49 = vld [vmem:[#allocation7_spill] sm:$0xff]  ;;  %v2117_v53 = vld [vmem:[#allocation8_spill] sm:$0xff] }
 0x17d   : > { %v852_v54 = vadd.f32 %v851_v50, %v1732_v6  ;;  %v987_v35 = vadd.f32 %v986_v12, %v924_v40  ;;  %v943_v50 = vmul.f32 %v2116_v49, %v2116_v49 }
 0x17f   : > { %v853_v58 = vadd.f32 %v852_v54, %v1748_v10  ;;  %v988_v61 = vadd.f32 %v987_v35, %v925_v44  ;;  %v944_v44 = vmul.f32 %v2117_v53, %v2117_v53 }
 0x181   : > { %v854_v62 = vadd.f32 %v853_v58, %v1764_v14  ;;  %v989_v39 = vadd.f32 %v988_v61, %v926_v57  ;;  %v2118_v58 = vld [vmem:[#allocation9_spill] sm:$0xff] }
 0x182   : > { %v945_v35 = vmul.f32 %v2118_v58, %v2118_v58 }
 0x183   : > { %v855_v2 = vadd.f32 %v854_v62, %v1780_v18  ;;  %v990_v52 = vadd.f32 %v989_v39, %v927_v48  ;;  %v2119_v48 = vld [vmem:[#allocation10_spill] sm:$0xff]  ;;  %v2120_v39 = vld [vmem:[#allocation11_spill] sm:$0xff] }
 0x185   : > { %v856_v6 = vadd.f32 %v855_v2, %v1796_v22  ;;  %v991_v5 = vadd.f32 %v990_v52, %v928_v16  ;;  %v946_v2 = vmul.f32 %v2119_v48, %v2119_v48 }
 0x187   : > { %v857_v10 = vadd.f32 %v856_v6, %v1812_v26  ;;  %v992_v56 = vadd.f32 %v991_v5, %v929_v1  ;;  %v947_v1 = vmul.f32 %v2120_v39, %v2120_v39 }
 0x189   : > { %v858_v14 = vadd.f32 %v857_v10, %v1828_v30  ;;  %v993_v20 = vadd.f32 %v992_v56, %v930_v15  ;;  %v2121_v10 = vld [vmem:[#allocation12_spill] sm:$0xff] }
 0x18a   : > { %v948_v5 = vmul.f32 %v2121_v10, %v2121_v10 }
 0x18b   : > { %v859_v18 = vadd.f32 %v858_v14, %v1841_v34  ;;  %v994_v13 = vadd.f32 %v993_v20, %v931_v23  ;;  %v2122_v23 = vld [vmem:[#allocation13_spill] sm:$0xff] }
 0x18d   : > { %v860_v22 = vadd.f32 %v859_v18, %v1854_v38  ;;  %v995_v24 = vadd.f32 %v994_v13, %v932_v9  ;;  %v949_v18 = vmul.f32 %v2122_v23, %v2122_v23 }
 0x18f   : > { %v861_v26 = vadd.f32 %v860_v22, %v1622_v43  ;;  %v996_v60 = vadd.f32 %v995_v24, %v933_v7  ;;  %v2111_v43 = vld [vmem:[#allocation2_spill] sm:$0xff] }
 0x190   : > { %v938_v19 = vmul.f32 %v2111_v43, %v2111_v43 }
 0x191   : > { %v862_v30 = vadd.f32 %v861_v26, %v1638_v47  ;;  %v997_v21 = vadd.f32 %v996_v60, %v934_v11  ;;  %v2112_v47 = vld [vmem:[#allocation3_spill] sm:$0xff]  ;;  %v813_v60 = vld [vmem:[%s1539_s29] sm:$0x1] }
 0x192   : > { %v939_v0 = vmul.f32 %v2112_v47, %v2112_v47 }
 0x193   : > { %v863_v34 = vadd.f32 %v862_v30, %v1654_v51  ;;  %v998_v32 = vadd.f32 %v997_v21, %v935_v17  ;;  %v2113_v51 = vld [vmem:[#allocation4_spill] sm:$0xff] }
 0x194   : > { %v940_v41 = vmul.f32 %v2113_v51, %v2113_v51 }
 0x195   : > { %v864_v38 = vadd.f32 %v863_v34, %v1670_v55  ;;  %v999_v36 = vadd.f32 %v998_v32, %v936_v63  ;;  %v2114_v55 = vld [vmem:[#allocation5_spill] sm:$0xff]  ;;  %v885_v32 = vld [vmem:[%s1544_s6] sm:$0x1] }
 0x196   : > { %v941_v59 = vmul.f32 %v2114_v55, %v2114_v55 }
 0x197   : > { %v865_v25 = vadd.f32 %v864_v38, %v2111_v43  ;;  %v1000_v3 = vadd.f32 %v999_v36, %v937_v28 }
 0x199   : > { %v866_v29 = vadd.f32 %v865_v25, %v2112_v47  ;;  %v1001_v27 = vadd.f32 %v1000_v3, %v938_v19 }
 0x19b   : > { %v867_v33 = vadd.f32 %v866_v29, %v2113_v51  ;;  %v1002_v45 = vadd.f32 %v1001_v27, %v939_v0 }
 0x19d   : > { %v868_v37 = vadd.f32 %v867_v33, %v2114_v55  ;;  %v1003_v46 = vadd.f32 %v1002_v45, %v940_v41 }
 0x19f   : > { %v869_v4 = vadd.f32 %v868_v37, %v2115_v42  ;;  %v1004_v40 = vadd.f32 %v1003_v46, %v941_v59 }
 0x1a1   : > { %v870_v8 = vadd.f32 %v869_v4, %v2116_v49  ;;  %v1005_v12 = vadd.f32 %v1004_v40, %v942_v31 }
 0x1a3   : > { %v871_v54 = vadd.f32 %v870_v8, %v2117_v53  ;;  %v1006_v62 = vadd.f32 %v1005_v12, %v943_v50 }
 0x1a5   : > { %v872_v57 = vadd.f32 %v871_v54, %v2118_v58  ;;  %v1007_v16 = vadd.f32 %v1006_v62, %v944_v44 }
 0x1a7   : > { %v873_v61 = vadd.f32 %v872_v57, %v2119_v48  ;;  %v1008_v52 = vadd.f32 %v1007_v16, %v945_v35 }
 0x1a9   : > { %v874_v6 = vadd.f32 %v873_v61, %v2120_v39  ;;  %v1009_v14 = vadd.f32 %v1008_v52, %v946_v2 }
 0x1ab   : > { %v875_v15 = vadd.f32 %v874_v6, %v2121_v10  ;;  %v1010_v9 = vadd.f32 %v1009_v14, %v947_v1 }
 0x1ad   : > { %v876_v56 = vadd.f32 %v875_v15, %v2122_v23  ;;  %v1011_v22 = vadd.f32 %v1010_v9, %v948_v5 }
 0x1af   : > { %v877_v20 = vrot.slane %v876_v56, 4  ;;  %v1012_v13 = vadd.f32 %v1011_v22, %v949_v18 }
 0x1b1   : > { %v878_v7 = vadd.f32 %v877_v20, %v876_v56  ;;  %v1013_v11 = vrot.slane %v1012_v13, 4 }
 0x1b3   : > { %v879_v26 = vrot.slane %v878_v7, 2  ;;  %v1014_v30 = vadd.f32 %v1013_v11, %v1012_v13 }
 0x1b5   : > { %v880_v24 = vadd.f32 %v879_v26, %v878_v7  ;;  %v1015_v34 = vrot.slane %v1014_v30, 2 }
 0x1b7   : > { %v881_v17 = vrot.slane %v880_v24, 1  ;;  %v1016_v21 = vadd.f32 %v1015_v34, %v1014_v30 }
 0x1b9   : > { %v882_v63 = vadd.f32 %v881_v17, %v880_v24  ;;  %v1017_v28 = vrot.slane %v1016_v21, 1 }
 0x1bb   : > { %v883_v38 = vadd.f32 %v882_v63, %v813_v60  ;;  %v1018_v43 = vadd.f32 %v1017_v28, %v1016_v21 }
 0x1bd   : > { %884 = vst [vmem:[%s1539_s29] sm:$0x1] %v883_v38  ;;  %v1019_v25 = vadd.f32 %v1018_v43, %v885_v32 }
 0x1bf   : > { %1020 = vst [vmem:[%s1544_s6] sm:$0x1] %v1019_v25 }
 0x1c0 PF: > { %s15_s19 = sadd.s32 1, %s1466_s19   ;;  %s2123_s15 = smov %s1458_s17 }
 0x1c1   : > { %p12_p8 = scmp.ge.s32.totalorder %s15_s19, 6   ;;  %s2124_s16 = smov %s1462_s18 }
 0x1c2   : > { %s2125_s17 = smov %s2128_s20  ;;  %s2126_s18 = smov %s2132_s21 }
 0x1c3   :  { %14 = sbr.rel (!%p12_p8) target bundleno = 3 (0x3), region = 86 }

</bundles_post_ra>
